<compile_context>
chip_gen: v5e
topology: v5e:2x2
jax: 0.10.0
libtpu: 0.0.40
codegen_flags: <defaults>
</compile_context>

<pallas_src>
import jax
import jax.numpy as jnp
from jax.experimental import pallas as pl
from jax.experimental.pallas import tpu as pltpu

# ----------------------------- small config ---------------------------------
B = 2                        # batch
C = 3                        # image channels
IMG = 16                     # image height == width
PATCH = 4                    # patch size
GRIDN = IMG // PATCH         # 4 patches per side
N_PATCHES = GRIDN * GRIDN    # 16
EMBED = 32                   # hidden dim
HEADS = 4
HEAD_DIM = EMBED // HEADS    # 8
DEPTH = 2                    # transformer blocks
MLP_HIDDEN = EMBED * 4       # 128
MASK_RATIO = 0.1
LEN_KEEP = int(N_PATCHES * (1.0 - MASK_RATIO))   # 14 kept patches
SEQ = LEN_KEEP + 1                               # +1 cls token = 15
SEQ_PAD = 16                                     # padded for lane-dense store
PATCH_DIM = C * PATCH * PATCH                    # 48
IN_DIM = PATCH_DIM + EMBED                       # 80: [patch | pos(+b)/cls]
LANES = 128
OUT_ROWS = SEQ_PAD * EMBED // LANES              # 4  -> output block (4, 128)
LN_EPS = 1e-6
ATTN_SCALE = HEAD_DIM ** -0.5


# ----------------------------- Pallas kernel ---------------------------------
def _layernorm(v, w, b):
    mu = jnp.mean(v, axis=-1, keepdims=True)
    var = jnp.mean(v * v, axis=-1, keepdims=True) - mu * mu   # one-pass variance
    return (v - mu) * jax.lax.rsqrt(var + LN_EPS) * w + b


def _fused_vit_kernel(x_in_ref, w_in_ref, wslab_ref, vslab_ref, o_ref):
    # ---- token embedding: patch-proj + pos add + cls row in ONE bf16 matmul.
    # x_in rows are [patch_pixels | pos+patch_b] (and [0 | cls+pos] for row 0);
    # w_in is [patch_w ; I_EMBED], so x_in @ w_in == patch@W + pos + b exactly.
    x = jnp.dot(x_in_ref[0].astype(jnp.bfloat16), w_in_ref[...],
                preferred_element_type=jnp.float32)            # (SEQ, EMBED) f32

    for d in range(DEPTH):                                     # static unrolled
        # static slices into the packed, VMEM-resident weight/bias slabs
        wqkv  = wslab_ref[d, 0:EMBED, 0:3 * EMBED]             # (32, 96)  bf16
        wproj = wslab_ref[d, 0:EMBED, 3 * EMBED:4 * EMBED]     # (32, 32)  bf16
        wfc1  = wslab_ref[d, EMBED:2 * EMBED, :]               # (32, 128) bf16
        wfc2t = wslab_ref[d, 2 * EMBED:3 * EMBED, :]           # (32, 128) bf16 = fc2^T
        ln1w  = vslab_ref[d, 0:1, 0:EMBED]
        ln1b  = vslab_ref[d, 1:2, 0:EMBED]
        bqkv  = vslab_ref[d, 2:3, 0:3 * EMBED]
        bproj = vslab_ref[d, 3:4, 0:EMBED]
        ln2w  = vslab_ref[d, 4:5, 0:EMBED]
        ln2b  = vslab_ref[d, 5:6, 0:EMBED]
        bfc1  = vslab_ref[d, 6:7, :]
        bfc2  = vslab_ref[d, 7:8, 0:EMBED]

        # ---- attention branch: x + proj(MHSA(LN1(x))) ----
        h = _layernorm(x, ln1w, ln1b)
        qkv = jnp.dot(h.astype(jnp.bfloat16), wqkv,
                      preferred_element_type=jnp.float32) + bqkv   # (SEQ, 96)
        heads = []
        for hd in range(HEADS):                                # static unrolled
            lo = hd * HEAD_DIM
            qh = qkv[:, lo:lo + HEAD_DIM].astype(jnp.bfloat16)
            kh = qkv[:, EMBED + lo:EMBED + lo + HEAD_DIM].astype(jnp.bfloat16)
            vh = qkv[:, 2 * EMBED + lo:2 * EMBED + lo + HEAD_DIM].astype(jnp.bfloat16)
            s = jax.lax.dot_general(qh, kh, (((1,), (1,)), ((), ())),
                                    preferred_element_type=jnp.float32) * ATTN_SCALE
            s = s - jnp.max(s, axis=-1, keepdims=True)
            e = jnp.exp(s)
            p = e * pl.reciprocal(jnp.sum(e, axis=-1, keepdims=True), approx=True)
            heads.append(jnp.dot(p.astype(jnp.bfloat16), vh,
                                 preferred_element_type=jnp.float32))
        ctx = jnp.concatenate(heads, axis=-1)                  # (SEQ, EMBED)
        x = x + jnp.dot(ctx.astype(jnp.bfloat16), wproj,
                        preferred_element_type=jnp.float32) + bproj

        # ---- MLP branch: x + fc2(gelu(fc1(LN2(x)))) ----
        h2 = _layernorm(x, ln2w, ln2b)
        m = jnp.dot(h2.astype(jnp.bfloat16), wfc1,
                    preferred_element_type=jnp.float32) + bfc1
        # TODO(synk): timm nn.GELU is exact-erf; tanh approximation used for
        # robust Mosaic lowering.
        m = jax.nn.gelu(m, approximate=True)
        y = jax.lax.dot_general(m.astype(jnp.bfloat16), wfc2t,
                                (((1,), (1,)), ((), ())),       # m @ fc2 (fc2 stored ^T)
                                preferred_element_type=jnp.float32)
        x = x + y + bfc2

    # ---- lane-dense output: pad SEQ 15->16, pack (16,32) into (4,128) so the
    # writeback is an unmasked, dense store.  Unpacked in the wrapper.
    xp = jnp.concatenate([x, jnp.zeros((SEQ_PAD - SEQ, EMBED), jnp.float32)], axis=0)
    dense = jnp.concatenate([xp[0:4], xp[4:8], xp[8:12], xp[12:16]], axis=-1)
    o_ref[0] = dense                                           # (4, 128)


# ----------------------------- Pallas wrapper ---------------------------------
def masked_vit_pallas(x_tokens, w_in, wslab, vslab):
    out = pl.pallas_call(
        _fused_vit_kernel,
        out_shape=jax.ShapeDtypeStruct((B, OUT_ROWS, LANES), jnp.float32),
        grid=(B,),
        in_specs=[
            pl.BlockSpec((1, SEQ, IN_DIM), lambda i: (i, 0, 0)),        # per-sample
            pl.BlockSpec((IN_DIM, EMBED), lambda i: (0, 0)),            # replicated
            pl.BlockSpec((DEPTH, 3 * EMBED, 4 * EMBED), lambda i: (0, 0, 0)),
            pl.BlockSpec((DEPTH, 8, LANES), lambda i: (0, 0, 0)),
        ],
        out_specs=pl.BlockSpec((1, OUT_ROWS, LANES), lambda i: (i, 0, 0)),
        compiler_params=pltpu.CompilerParams(dimension_semantics=("parallel",)),
    )(x_tokens, w_in, wslab, vslab)
    # undo the lane-dense packing: dense[r, 32*j + c] == x[4*j + r, c]
    y = out.reshape(B, OUT_ROWS, SEQ_PAD // OUT_ROWS, EMBED)
    y = y.transpose(0, 2, 1, 3).reshape(B, SEQ_PAD, EMBED)
    return y[:, :SEQ, :]


# ----------------------------- plain-JAX glue ---------------------------------
def extract_patches(x):
    # x: (B, C, H, W) NCHW -> (B, N_PATCHES, C*PATCH*PATCH), channel-major per patch
    xr = x.reshape(B, C, GRIDN, PATCH, GRIDN, PATCH)
    xr = xr.transpose(0, 2, 4, 1, 3, 5)          # (B, Hn, Wn, C, ph, pw)
    return xr.reshape(B, N_PATCHES, PATCH_DIM)


def init_params(key):
    keys = jax.random.split(key, 3 + DEPTH)

    def norm(k, shape, std=0.02):
        return (std * jax.random.normal(k, shape)).astype(jnp.float32)

    patch_w = norm(keys[0], (PATCH_DIM, EMBED))
    patch_b = jnp.zeros((EMBED,), jnp.float32)
    pos_embed = norm(keys[1], (1, N_PATCHES + 1, EMBED))
    cls_token = norm(keys[2], (1, 1, EMBED))

    w_qkv, w_proj, w_fc1, w_fc2 = [], [], [], []
    for d in range(DEPTH):
        bk = jax.random.split(keys[3 + d], 4)
        w_qkv.append(norm(bk[0], (EMBED, 3 * EMBED)))
        w_proj.append(norm(bk[1], (EMBED, EMBED)))
        w_fc1.append(norm(bk[2], (EMBED, MLP_HIDDEN)))
        w_fc2.append(norm(bk[3], (MLP_HIDDEN, EMBED)))
    w_qkv, w_proj = jnp.stack(w_qkv), jnp.stack(w_proj)
    w_fc1, w_fc2 = jnp.stack(w_fc1), jnp.stack(w_fc2)

    ln1_w = jnp.ones((DEPTH, EMBED), jnp.float32)
    ln1_b = jnp.zeros((DEPTH, EMBED), jnp.float32)
    ln2_w = jnp.ones((DEPTH, EMBED), jnp.float32)
    ln2_b = jnp.zeros((DEPTH, EMBED), jnp.float32)
    b_qkv = jnp.zeros((DEPTH, 3 * EMBED), jnp.float32)
    b_proj = jnp.zeros((DEPTH, EMBED), jnp.float32)
    b_fc1 = jnp.zeros((DEPTH, MLP_HIDDEN), jnp.float32)
    b_fc2 = jnp.zeros((DEPTH, EMBED), jnp.float32)

    # ---- pack into lane-dense slabs consumed by the kernel (4 DMAs total) ----
    # w_in: patch-embed weight stacked on an identity block so that
    # [patch | pos+b] @ w_in == patch @ patch_w + pos + patch_b in one MXU push.
    w_in = jnp.concatenate([patch_w, jnp.eye(EMBED, dtype=jnp.float32)],
                           axis=0).astype(jnp.bfloat16)                  # (80, 32)

    wslab = jnp.concatenate([
        jnp.concatenate([w_qkv, w_proj], axis=-1),    # rows  0:32 -> [qkv | proj]
        w_fc1,                                        # rows 32:64 -> fc1
        jnp.swapaxes(w_fc2, 1, 2),                    # rows 64:96 -> fc2^T
    ], axis=1).astype(jnp.bfloat16)                   # (DEPTH, 96, 128)

    def row(v):  # (DEPTH, k) -> (DEPTH, 1, 128), zero-padded along lanes
        return jnp.pad(v, ((0, 0), (0, LANES - v.shape[-1])))[:, None, :]

    vslab = jnp.concatenate(
        [row(ln1_w), row(ln1_b), row(b_qkv), row(b_proj),
         row(ln2_w), row(ln2_b), row(b_fc1), row(b_fc2)],
        axis=1).astype(jnp.float32)                   # (DEPTH, 8, 128)

    return {
        "pos_patches": pos_embed[:, 1:, :],                        # (1, 16, 32)
        "patch_b": patch_b,                                        # (32,)
        "cls_with_pos": (cls_token + pos_embed[:, :1, :])[0, 0],   # (32,)
        "w_in": w_in, "wslab": wslab, "vslab": vslab,
    }


def masked_vit_forward(x, params, mask_key):
    # forward_features (inference; pos_drop is identity at eval / drop_rate=0)
    patches = extract_patches(x)                                   # (B, 16, 48)

    # MAE-style masking: per-sample random shuffle, keep first LEN_KEEP patches.
    # TODO(synk): argsort-of-noise (data-dependent sort) has no Pallas
    # equivalent; the kept-row gather is also done here so the kernel only sees
    # dense kept tokens (removes the in-kernel one-hot matmul + ids DMA).
    noise = jax.random.uniform(mask_key, (B, N_PATCHES))
    ids_keep = jnp.argsort(noise, axis=1)[:, :LEN_KEEP]            # (B, 14)

    patches_kept = jax.vmap(lambda p, i: jnp.take(p, i, axis=0))(patches, ids_keep)
    pos_with_b = params["pos_patches"][0] + params["patch_b"]      # (16, 32)
    pos_kept = jnp.take(pos_with_b, ids_keep, axis=0)              # (B, 14, 32)

    tok_rows = jnp.concatenate([patches_kept, pos_kept], axis=-1)  # (B, 14, 80)
    cls_row = jnp.concatenate(
        [jnp.zeros((B, 1, PATCH_DIM), jnp.float32),
         jnp.broadcast_to(params["cls_with_pos"][None, None, :], (B, 1, EMBED))],
        axis=-1)                                                   # (B, 1, 80)
    x_tokens = jnp.concatenate([cls_row, tok_rows], axis=1)        # (B, 15, 80)

    return masked_vit_pallas(x_tokens, params["w_in"], params["wslab"],
                             params["vslab"])


# ----------------------------- main -------------------------------------------
if __name__ == "__main__":
    root = jax.random.PRNGKey(0)
    k_x, k_params, k_mask = jax.random.split(root, 3)

    x = jax.random.normal(k_x, (B, C, IMG, IMG), dtype=jnp.float32)
    params = init_params(k_params)

    fwd = jax.jit(masked_vit_forward)
    out = jax.block_until_ready(fwd(x, params, k_mask))

    assert out.shape == (B, SEQ, EMBED), out.shape
    assert bool(jnp.all(jnp.isfinite(out)))
    print("KERNEL_OK")
</pallas_src>

<mosaic_0001>
module attributes {stable_mosaic.version = 11 : i64} {
  func.func @_fused_vit_kernel(%arg0: i32, %arg1: memref<1x15x80xf32, #tpu.memory_space<vmem>>, %arg2: memref<80x32xbf16, #tpu.memory_space<vmem>>, %arg3: memref<2x96x128xbf16, #tpu.memory_space<vmem>>, %arg4: memref<2x8x128xf32, #tpu.memory_space<vmem>>, %arg5: memref<1x4x128xf32, #tpu.memory_space<vmem>>) attributes {dimension_semantics = [#tpu.dimension_semantics<parallel>], iteration_bounds = array<i64: 2>, scalar_prefetch = 0 : i64, scratch_operands = 0 : i64, tpu.core_type = #tpu.core_type<tc>, window_params = [{transform_indices = @transform_0, window_bounds = array<i64: 1, 15, 80>}, {pipeline_mode = #tpu.pipeline_mode<synchronous>, transform_indices = @transform_1, window_bounds = array<i64: 80, 32>}, {pipeline_mode = #tpu.pipeline_mode<synchronous>, transform_indices = @transform_2, window_bounds = array<i64: 2, 96, 128>}, {pipeline_mode = #tpu.pipeline_mode<synchronous>, transform_indices = @transform_3, window_bounds = array<i64: 2, 8, 128>}, {transform_indices = @transform_4, window_bounds = array<i64: 1, 4, 128>}]} {
    %c0 = arith.constant 0 : index
    %c0_0 = arith.constant 0 : index
    %c0_1 = arith.constant 0 : index
    %0 = vector.load %arg1[%c0, %c0_0, %c0_1] : memref<1x15x80xf32, #tpu.memory_space<vmem>>, vector<1x15x80xf32>
    %1 = vector.shape_cast %0 : vector<1x15x80xf32> to vector<15x80xf32>
    %2 = arith.truncf %1 : vector<15x80xf32> to vector<15x80xbf16>
    %c0_2 = arith.constant 0 : index
    %c0_3 = arith.constant 0 : index
    %3 = vector.load %arg2[%c0_2, %c0_3] : memref<80x32xbf16, #tpu.memory_space<vmem>>, vector<80x32xbf16>
    %cst = arith.constant dense<0.000000e+00> : vector<15x32xf32>
    %4 = tpu.matmul %2, %3, %cst {dimension_numbers = #tpu.dot_dimension_numbers<[1], [0], [0], [1], [0, 0, 1, 1], [], []>} : vector<15x80xbf16>, vector<80x32xbf16>, vector<15x32xf32> -> vector<15x32xf32>
    %c0_4 = arith.constant 0 : index
    %c0_5 = arith.constant 0 : index
    %c0_6 = arith.constant 0 : index
    %5 = vector.load %arg3[%c0_4, %c0_5, %c0_6] : memref<2x96x128xbf16, #tpu.memory_space<vmem>>, vector<1x32x96xbf16>
    %6 = vector.shape_cast %5 : vector<1x32x96xbf16> to vector<32x96xbf16>
    %c0_7 = arith.constant 0 : index
    %c0_8 = arith.constant 0 : index
    %c96 = arith.constant 96 : index
    %7 = vector.load %arg3[%c0_7, %c0_8, %c96] : memref<2x96x128xbf16, #tpu.memory_space<vmem>>, vector<1x32x32xbf16>
    %8 = vector.shape_cast %7 : vector<1x32x32xbf16> to vector<32x32xbf16>
    %c0_9 = arith.constant 0 : index
    %c32 = arith.constant 32 : index
    %c0_10 = arith.constant 0 : index
    %9 = vector.load %arg3[%c0_9, %c32, %c0_10] : memref<2x96x128xbf16, #tpu.memory_space<vmem>>, vector<1x32x128xbf16>
    %10 = vector.shape_cast %9 : vector<1x32x128xbf16> to vector<32x128xbf16>
    %c0_11 = arith.constant 0 : index
    %c64 = arith.constant 64 : index
    %c0_12 = arith.constant 0 : index
    %11 = vector.load %arg3[%c0_11, %c64, %c0_12] : memref<2x96x128xbf16, #tpu.memory_space<vmem>>, vector<1x32x128xbf16>
    %12 = vector.shape_cast %11 : vector<1x32x128xbf16> to vector<32x128xbf16>
    %c0_13 = arith.constant 0 : index
    %c0_14 = arith.constant 0 : index
    %c0_15 = arith.constant 0 : index
    %13 = vector.load %arg4[%c0_13, %c0_14, %c0_15] : memref<2x8x128xf32, #tpu.memory_space<vmem>>, vector<1x1x32xf32>
    %14 = vector.shape_cast %13 : vector<1x1x32xf32> to vector<1x32xf32>
    %c0_16 = arith.constant 0 : index
    %c1 = arith.constant 1 : index
    %c0_17 = arith.constant 0 : index
    %15 = vector.load %arg4[%c0_16, %c1, %c0_17] : memref<2x8x128xf32, #tpu.memory_space<vmem>>, vector<1x1x32xf32>
    %16 = vector.shape_cast %15 : vector<1x1x32xf32> to vector<1x32xf32>
    %c0_18 = arith.constant 0 : index
    %c2 = arith.constant 2 : index
    %c0_19 = arith.constant 0 : index
    %17 = vector.load %arg4[%c0_18, %c2, %c0_19] : memref<2x8x128xf32, #tpu.memory_space<vmem>>, vector<1x1x96xf32>
    %18 = vector.shape_cast %17 : vector<1x1x96xf32> to vector<1x96xf32>
    %c0_20 = arith.constant 0 : index
    %c3 = arith.constant 3 : index
    %c0_21 = arith.constant 0 : index
    %19 = vector.load %arg4[%c0_20, %c3, %c0_21] : memref<2x8x128xf32, #tpu.memory_space<vmem>>, vector<1x1x32xf32>
    %20 = vector.shape_cast %19 : vector<1x1x32xf32> to vector<1x32xf32>
    %c0_22 = arith.constant 0 : index
    %c4 = arith.constant 4 : index
    %c0_23 = arith.constant 0 : index
    %21 = vector.load %arg4[%c0_22, %c4, %c0_23] : memref<2x8x128xf32, #tpu.memory_space<vmem>>, vector<1x1x32xf32>
    %22 = vector.shape_cast %21 : vector<1x1x32xf32> to vector<1x32xf32>
    %c0_24 = arith.constant 0 : index
    %c5 = arith.constant 5 : index
    %c0_25 = arith.constant 0 : index
    %23 = vector.load %arg4[%c0_24, %c5, %c0_25] : memref<2x8x128xf32, #tpu.memory_space<vmem>>, vector<1x1x32xf32>
    %24 = vector.shape_cast %23 : vector<1x1x32xf32> to vector<1x32xf32>
    %c0_26 = arith.constant 0 : index
    %c6 = arith.constant 6 : index
    %c0_27 = arith.constant 0 : index
    %25 = vector.load %arg4[%c0_26, %c6, %c0_27] : memref<2x8x128xf32, #tpu.memory_space<vmem>>, vector<1x1x128xf32>
    %26 = vector.shape_cast %25 : vector<1x1x128xf32> to vector<1x128xf32>
    %c0_28 = arith.constant 0 : index
    %c7 = arith.constant 7 : index
    %c0_29 = arith.constant 0 : index
    %27 = vector.load %arg4[%c0_28, %c7, %c0_29] : memref<2x8x128xf32, #tpu.memory_space<vmem>>, vector<1x1x32xf32>
    %28 = vector.shape_cast %27 : vector<1x1x32xf32> to vector<1x32xf32>
    %cst_30 = arith.constant dense<0.000000e+00> : vector<15xf32>
    %29 = vector.multi_reduction <add>, %4, %cst_30 [1] : vector<15x32xf32> to vector<15xf32>
    %30 = vector.shape_cast %29 : vector<15xf32> to vector<15x1xf32>
    %cst_31 = arith.constant 3.200000e+01 : f32
    %31 = vector.broadcast %cst_31 : f32 to vector<15x1xf32>
    %32 = arith.divf %30, %31 : vector<15x1xf32>
    %33 = arith.mulf %4, %4 : vector<15x32xf32>
    %cst_32 = arith.constant dense<0.000000e+00> : vector<15xf32>
    %34 = vector.multi_reduction <add>, %33, %cst_32 [1] : vector<15x32xf32> to vector<15xf32>
    %35 = vector.shape_cast %34 : vector<15xf32> to vector<15x1xf32>
    %cst_33 = arith.constant 3.200000e+01 : f32
    %36 = vector.broadcast %cst_33 : f32 to vector<15x1xf32>
    %37 = arith.divf %35, %36 : vector<15x1xf32>
    %38 = arith.mulf %32, %32 : vector<15x1xf32>
    %39 = arith.subf %37, %38 : vector<15x1xf32>
    %40 = vector.broadcast %32 : vector<15x1xf32> to vector<15x32xf32>
    %41 = arith.subf %4, %40 : vector<15x32xf32>
    %cst_34 = arith.constant 9.99999997E-7 : f32
    %42 = vector.broadcast %cst_34 : f32 to vector<15x1xf32>
    %43 = arith.addf %39, %42 : vector<15x1xf32>
    %44 = math.rsqrt %43 : vector<15x1xf32>
    %45 = vector.broadcast %44 : vector<15x1xf32> to vector<15x32xf32>
    %46 = arith.mulf %41, %45 : vector<15x32xf32>
    %47 = vector.broadcast %14 : vector<1x32xf32> to vector<15x32xf32>
    %48 = arith.mulf %46, %47 : vector<15x32xf32>
    %49 = vector.broadcast %16 : vector<1x32xf32> to vector<15x32xf32>
    %50 = arith.addf %48, %49 : vector<15x32xf32>
    %51 = arith.truncf %50 : vector<15x32xf32> to vector<15x32xbf16>
    %cst_35 = arith.constant dense<0.000000e+00> : vector<15x96xf32>
    %52 = tpu.matmul %51, %6, %cst_35 {dimension_numbers = #tpu.dot_dimension_numbers<[1], [0], [0], [1], [0, 0, 1, 1], [], []>} : vector<15x32xbf16>, vector<32x96xbf16>, vector<15x96xf32> -> vector<15x96xf32>
    %53 = vector.broadcast %18 : vector<1x96xf32> to vector<15x96xf32>
    %54 = arith.addf %52, %53 : vector<15x96xf32>
    %55 = vector.extract_strided_slice %54 {offsets = [0, 0], sizes = [15, 8], strides = [1, 1]} : vector<15x96xf32> to vector<15x8xf32>
    %56 = arith.truncf %55 : vector<15x8xf32> to vector<15x8xbf16>
    %57 = vector.extract_strided_slice %54 {offsets = [0, 32], sizes = [15, 8], strides = [1, 1]} : vector<15x96xf32> to vector<15x8xf32>
    %58 = arith.truncf %57 : vector<15x8xf32> to vector<15x8xbf16>
    %59 = vector.extract_strided_slice %54 {offsets = [0, 64], sizes = [15, 8], strides = [1, 1]} : vector<15x96xf32> to vector<15x8xf32>
    %60 = arith.truncf %59 : vector<15x8xf32> to vector<15x8xbf16>
    %cst_36 = arith.constant dense<0.000000e+00> : vector<15x15xf32>
    %61 = tpu.matmul %56, %58, %cst_36 {dimension_numbers = #tpu.dot_dimension_numbers<[1], [1], [0], [0], [0, 0, 1, 0], [], []>} : vector<15x8xbf16>, vector<15x8xbf16>, vector<15x15xf32> -> vector<15x15xf32>
    %cst_37 = arith.constant 0.353553385 : f32
    %62 = vector.broadcast %cst_37 : f32 to vector<15x15xf32>
    %63 = arith.mulf %61, %62 : vector<15x15xf32>
    %cst_38 = arith.constant dense<0xFF800000> : vector<15xf32>
    %64 = vector.multi_reduction <maximumf>, %63, %cst_38 [1] : vector<15x15xf32> to vector<15xf32>
    %65 = vector.shape_cast %64 : vector<15xf32> to vector<15x1xf32>
    %66 = vector.broadcast %65 : vector<15x1xf32> to vector<15x15xf32>
    %67 = arith.subf %63, %66 : vector<15x15xf32>
    %68 = math.exp %67 : vector<15x15xf32>
    %cst_39 = arith.constant dense<0.000000e+00> : vector<15xf32>
    %69 = vector.multi_reduction <add>, %68, %cst_39 [1] : vector<15x15xf32> to vector<15xf32>
    %70 = vector.shape_cast %69 : vector<15xf32> to vector<15x1xf32>
    %71 = tpu.reciprocal %70 {approx = true} : vector<15x1xf32> -> vector<15x1xf32>
    %72 = vector.broadcast %71 : vector<15x1xf32> to vector<15x15xf32>
    %73 = arith.mulf %68, %72 : vector<15x15xf32>
    %74 = arith.truncf %73 : vector<15x15xf32> to vector<15x15xbf16>
    %cst_40 = arith.constant dense<0.000000e+00> : vector<15x8xf32>
    %75 = tpu.matmul %74, %60, %cst_40 {dimension_numbers = #tpu.dot_dimension_numbers<[1], [0], [0], [1], [0, 0, 1, 1], [], []>} : vector<15x15xbf16>, vector<15x8xbf16>, vector<15x8xf32> -> vector<15x8xf32>
    %76 = vector.extract_strided_slice %54 {offsets = [0, 8], sizes = [15, 8], strides = [1, 1]} : vector<15x96xf32> to vector<15x8xf32>
    %77 = arith.truncf %76 : vector<15x8xf32> to vector<15x8xbf16>
    %78 = vector.extract_strided_slice %54 {offsets = [0, 40], sizes = [15, 8], strides = [1, 1]} : vector<15x96xf32> to vector<15x8xf32>
    %79 = arith.truncf %78 : vector<15x8xf32> to vector<15x8xbf16>
    %80 = vector.extract_strided_slice %54 {offsets = [0, 72], sizes = [15, 8], strides = [1, 1]} : vector<15x96xf32> to vector<15x8xf32>
    %81 = arith.truncf %80 : vector<15x8xf32> to vector<15x8xbf16>
    %cst_41 = arith.constant dense<0.000000e+00> : vector<15x15xf32>
    %82 = tpu.matmul %77, %79, %cst_41 {dimension_numbers = #tpu.dot_dimension_numbers<[1], [1], [0], [0], [0, 0, 1, 0], [], []>} : vector<15x8xbf16>, vector<15x8xbf16>, vector<15x15xf32> -> vector<15x15xf32>
    %cst_42 = arith.constant 0.353553385 : f32
    %83 = vector.broadcast %cst_42 : f32 to vector<15x15xf32>
    %84 = arith.mulf %82, %83 : vector<15x15xf32>
    %cst_43 = arith.constant dense<0xFF800000> : vector<15xf32>
    %85 = vector.multi_reduction <maximumf>, %84, %cst_43 [1] : vector<15x15xf32> to vector<15xf32>
    %86 = vector.shape_cast %85 : vector<15xf32> to vector<15x1xf32>
    %87 = vector.broadcast %86 : vector<15x1xf32> to vector<15x15xf32>
    %88 = arith.subf %84, %87 : vector<15x15xf32>
    %89 = math.exp %88 : vector<15x15xf32>
    %cst_44 = arith.constant dense<0.000000e+00> : vector<15xf32>
    %90 = vector.multi_reduction <add>, %89, %cst_44 [1] : vector<15x15xf32> to vector<15xf32>
    %91 = vector.shape_cast %90 : vector<15xf32> to vector<15x1xf32>
    %92 = tpu.reciprocal %91 {approx = true} : vector<15x1xf32> -> vector<15x1xf32>
    %93 = vector.broadcast %92 : vector<15x1xf32> to vector<15x15xf32>
    %94 = arith.mulf %89, %93 : vector<15x15xf32>
    %95 = arith.truncf %94 : vector<15x15xf32> to vector<15x15xbf16>
    %cst_45 = arith.constant dense<0.000000e+00> : vector<15x8xf32>
    %96 = tpu.matmul %95, %81, %cst_45 {dimension_numbers = #tpu.dot_dimension_numbers<[1], [0], [0], [1], [0, 0, 1, 1], [], []>} : vector<15x15xbf16>, vector<15x8xbf16>, vector<15x8xf32> -> vector<15x8xf32>
    %97 = vector.extract_strided_slice %54 {offsets = [0, 16], sizes = [15, 8], strides = [1, 1]} : vector<15x96xf32> to vector<15x8xf32>
    %98 = arith.truncf %97 : vector<15x8xf32> to vector<15x8xbf16>
    %99 = vector.extract_strided_slice %54 {offsets = [0, 48], sizes = [15, 8], strides = [1, 1]} : vector<15x96xf32> to vector<15x8xf32>
    %100 = arith.truncf %99 : vector<15x8xf32> to vector<15x8xbf16>
    %101 = vector.extract_strided_slice %54 {offsets = [0, 80], sizes = [15, 8], strides = [1, 1]} : vector<15x96xf32> to vector<15x8xf32>
    %102 = arith.truncf %101 : vector<15x8xf32> to vector<15x8xbf16>
    %cst_46 = arith.constant dense<0.000000e+00> : vector<15x15xf32>
    %103 = tpu.matmul %98, %100, %cst_46 {dimension_numbers = #tpu.dot_dimension_numbers<[1], [1], [0], [0], [0, 0, 1, 0], [], []>} : vector<15x8xbf16>, vector<15x8xbf16>, vector<15x15xf32> -> vector<15x15xf32>
    %cst_47 = arith.constant 0.353553385 : f32
    %104 = vector.broadcast %cst_47 : f32 to vector<15x15xf32>
    %105 = arith.mulf %103, %104 : vector<15x15xf32>
    %cst_48 = arith.constant dense<0xFF800000> : vector<15xf32>
    %106 = vector.multi_reduction <maximumf>, %105, %cst_48 [1] : vector<15x15xf32> to vector<15xf32>
    %107 = vector.shape_cast %106 : vector<15xf32> to vector<15x1xf32>
    %108 = vector.broadcast %107 : vector<15x1xf32> to vector<15x15xf32>
    %109 = arith.subf %105, %108 : vector<15x15xf32>
    %110 = math.exp %109 : vector<15x15xf32>
    %cst_49 = arith.constant dense<0.000000e+00> : vector<15xf32>
    %111 = vector.multi_reduction <add>, %110, %cst_49 [1] : vector<15x15xf32> to vector<15xf32>
    %112 = vector.shape_cast %111 : vector<15xf32> to vector<15x1xf32>
    %113 = tpu.reciprocal %112 {approx = true} : vector<15x1xf32> -> vector<15x1xf32>
    %114 = vector.broadcast %113 : vector<15x1xf32> to vector<15x15xf32>
    %115 = arith.mulf %110, %114 : vector<15x15xf32>
    %116 = arith.truncf %115 : vector<15x15xf32> to vector<15x15xbf16>
    %cst_50 = arith.constant dense<0.000000e+00> : vector<15x8xf32>
    %117 = tpu.matmul %116, %102, %cst_50 {dimension_numbers = #tpu.dot_dimension_numbers<[1], [0], [0], [1], [0, 0, 1, 1], [], []>} : vector<15x15xbf16>, vector<15x8xbf16>, vector<15x8xf32> -> vector<15x8xf32>
    %118 = vector.extract_strided_slice %54 {offsets = [0, 24], sizes = [15, 8], strides = [1, 1]} : vector<15x96xf32> to vector<15x8xf32>
    %119 = arith.truncf %118 : vector<15x8xf32> to vector<15x8xbf16>
    %120 = vector.extract_strided_slice %54 {offsets = [0, 56], sizes = [15, 8], strides = [1, 1]} : vector<15x96xf32> to vector<15x8xf32>
    %121 = arith.truncf %120 : vector<15x8xf32> to vector<15x8xbf16>
    %122 = vector.extract_strided_slice %54 {offsets = [0, 88], sizes = [15, 8], strides = [1, 1]} : vector<15x96xf32> to vector<15x8xf32>
    %123 = arith.truncf %122 : vector<15x8xf32> to vector<15x8xbf16>
    %cst_51 = arith.constant dense<0.000000e+00> : vector<15x15xf32>
    %124 = tpu.matmul %119, %121, %cst_51 {dimension_numbers = #tpu.dot_dimension_numbers<[1], [1], [0], [0], [0, 0, 1, 0], [], []>} : vector<15x8xbf16>, vector<15x8xbf16>, vector<15x15xf32> -> vector<15x15xf32>
    %cst_52 = arith.constant 0.353553385 : f32
    %125 = vector.broadcast %cst_52 : f32 to vector<15x15xf32>
    %126 = arith.mulf %124, %125 : vector<15x15xf32>
    %cst_53 = arith.constant dense<0xFF800000> : vector<15xf32>
    %127 = vector.multi_reduction <maximumf>, %126, %cst_53 [1] : vector<15x15xf32> to vector<15xf32>
    %128 = vector.shape_cast %127 : vector<15xf32> to vector<15x1xf32>
    %129 = vector.broadcast %128 : vector<15x1xf32> to vector<15x15xf32>
    %130 = arith.subf %126, %129 : vector<15x15xf32>
    %131 = math.exp %130 : vector<15x15xf32>
    %cst_54 = arith.constant dense<0.000000e+00> : vector<15xf32>
    %132 = vector.multi_reduction <add>, %131, %cst_54 [1] : vector<15x15xf32> to vector<15xf32>
    %133 = vector.shape_cast %132 : vector<15xf32> to vector<15x1xf32>
    %134 = tpu.reciprocal %133 {approx = true} : vector<15x1xf32> -> vector<15x1xf32>
    %135 = vector.broadcast %134 : vector<15x1xf32> to vector<15x15xf32>
    %136 = arith.mulf %131, %135 : vector<15x15xf32>
    %137 = arith.truncf %136 : vector<15x15xf32> to vector<15x15xbf16>
    %cst_55 = arith.constant dense<0.000000e+00> : vector<15x8xf32>
    %138 = tpu.matmul %137, %123, %cst_55 {dimension_numbers = #tpu.dot_dimension_numbers<[1], [0], [0], [1], [0, 0, 1, 1], [], []>} : vector<15x15xbf16>, vector<15x8xbf16>, vector<15x8xf32> -> vector<15x8xf32>
    %139 = tpu.concatenate %75, %96, %117, %138 in 1 : vector<15x8xf32>, vector<15x8xf32>, vector<15x8xf32>, vector<15x8xf32> -> vector<15x32xf32>
    %140 = arith.truncf %139 : vector<15x32xf32> to vector<15x32xbf16>
    %cst_56 = arith.constant dense<0.000000e+00> : vector<15x32xf32>
    %141 = tpu.matmul %140, %8, %cst_56 {dimension_numbers = #tpu.dot_dimension_numbers<[1], [0], [0], [1], [0, 0, 1, 1], [], []>} : vector<15x32xbf16>, vector<32x32xbf16>, vector<15x32xf32> -> vector<15x32xf32>
    %142 = arith.addf %4, %141 : vector<15x32xf32>
    %143 = vector.broadcast %20 : vector<1x32xf32> to vector<15x32xf32>
    %144 = arith.addf %142, %143 : vector<15x32xf32>
    %cst_57 = arith.constant dense<0.000000e+00> : vector<15xf32>
    %145 = vector.multi_reduction <add>, %144, %cst_57 [1] : vector<15x32xf32> to vector<15xf32>
    %146 = vector.shape_cast %145 : vector<15xf32> to vector<15x1xf32>
    %cst_58 = arith.constant 3.200000e+01 : f32
    %147 = vector.broadcast %cst_58 : f32 to vector<15x1xf32>
    %148 = arith.divf %146, %147 : vector<15x1xf32>
    %149 = arith.mulf %144, %144 : vector<15x32xf32>
    %cst_59 = arith.constant dense<0.000000e+00> : vector<15xf32>
    %150 = vector.multi_reduction <add>, %149, %cst_59 [1] : vector<15x32xf32> to vector<15xf32>
    %151 = vector.shape_cast %150 : vector<15xf32> to vector<15x1xf32>
    %cst_60 = arith.constant 3.200000e+01 : f32
    %152 = vector.broadcast %cst_60 : f32 to vector<15x1xf32>
    %153 = arith.divf %151, %152 : vector<15x1xf32>
    %154 = arith.mulf %148, %148 : vector<15x1xf32>
    %155 = arith.subf %153, %154 : vector<15x1xf32>
    %156 = vector.broadcast %148 : vector<15x1xf32> to vector<15x32xf32>
    %157 = arith.subf %144, %156 : vector<15x32xf32>
    %cst_61 = arith.constant 9.99999997E-7 : f32
    %158 = vector.broadcast %cst_61 : f32 to vector<15x1xf32>
    %159 = arith.addf %155, %158 : vector<15x1xf32>
    %160 = math.rsqrt %159 : vector<15x1xf32>
    %161 = vector.broadcast %160 : vector<15x1xf32> to vector<15x32xf32>
    %162 = arith.mulf %157, %161 : vector<15x32xf32>
    %163 = vector.broadcast %22 : vector<1x32xf32> to vector<15x32xf32>
    %164 = arith.mulf %162, %163 : vector<15x32xf32>
    %165 = vector.broadcast %24 : vector<1x32xf32> to vector<15x32xf32>
    %166 = arith.addf %164, %165 : vector<15x32xf32>
    %167 = arith.truncf %166 : vector<15x32xf32> to vector<15x32xbf16>
    %cst_62 = arith.constant dense<0.000000e+00> : vector<15x128xf32>
    %168 = tpu.matmul %167, %10, %cst_62 {dimension_numbers = #tpu.dot_dimension_numbers<[1], [0], [0], [1], [0, 0, 1, 1], [], []>} : vector<15x32xbf16>, vector<32x128xbf16>, vector<15x128xf32> -> vector<15x128xf32>
    %169 = vector.broadcast %26 : vector<1x128xf32> to vector<15x128xf32>
    %170 = arith.addf %168, %169 : vector<15x128xf32>
    %171 = arith.mulf %170, %170 : vector<15x128xf32>
    %172 = arith.mulf %170, %171 : vector<15x128xf32>
    %cst_63 = arith.constant 4.471500e-02 : f32
    %173 = vector.broadcast %cst_63 : f32 to vector<15x128xf32>
    %174 = arith.mulf %173, %172 : vector<15x128xf32>
    %175 = arith.addf %170, %174 : vector<15x128xf32>
    %cst_64 = arith.constant 0.797884583 : f32
    %176 = vector.broadcast %cst_64 : f32 to vector<15x128xf32>
    %177 = arith.mulf %176, %175 : vector<15x128xf32>
    %178 = math.tanh %177 : vector<15x128xf32>
    %cst_65 = arith.constant 1.000000e+00 : f32
    %179 = vector.broadcast %cst_65 : f32 to vector<15x128xf32>
    %180 = arith.addf %179, %178 : vector<15x128xf32>
    %cst_66 = arith.constant 5.000000e-01 : f32
    %181 = vector.broadcast %cst_66 : f32 to vector<15x128xf32>
    %182 = arith.mulf %181, %180 : vector<15x128xf32>
    %183 = arith.mulf %170, %182 : vector<15x128xf32>
    %184 = arith.truncf %183 : vector<15x128xf32> to vector<15x128xbf16>
    %cst_67 = arith.constant dense<0.000000e+00> : vector<15x32xf32>
    %185 = tpu.matmul %184, %12, %cst_67 {dimension_numbers = #tpu.dot_dimension_numbers<[1], [1], [0], [0], [0, 0, 1, 0], [], []>} : vector<15x128xbf16>, vector<32x128xbf16>, vector<15x32xf32> -> vector<15x32xf32>
    %186 = arith.addf %144, %185 : vector<15x32xf32>
    %187 = vector.broadcast %28 : vector<1x32xf32> to vector<15x32xf32>
    %188 = arith.addf %186, %187 : vector<15x32xf32>
    %c1_68 = arith.constant 1 : index
    %c0_69 = arith.constant 0 : index
    %c0_70 = arith.constant 0 : index
    %189 = vector.load %arg3[%c1_68, %c0_69, %c0_70] : memref<2x96x128xbf16, #tpu.memory_space<vmem>>, vector<1x32x96xbf16>
    %190 = vector.shape_cast %189 : vector<1x32x96xbf16> to vector<32x96xbf16>
    %c1_71 = arith.constant 1 : index
    %c0_72 = arith.constant 0 : index
    %c96_73 = arith.constant 96 : index
    %191 = vector.load %arg3[%c1_71, %c0_72, %c96_73] : memref<2x96x128xbf16, #tpu.memory_space<vmem>>, vector<1x32x32xbf16>
    %192 = vector.shape_cast %191 : vector<1x32x32xbf16> to vector<32x32xbf16>
    %c1_74 = arith.constant 1 : index
    %c32_75 = arith.constant 32 : index
    %c0_76 = arith.constant 0 : index
    %193 = vector.load %arg3[%c1_74, %c32_75, %c0_76] : memref<2x96x128xbf16, #tpu.memory_space<vmem>>, vector<1x32x128xbf16>
    %194 = vector.shape_cast %193 : vector<1x32x128xbf16> to vector<32x128xbf16>
    %c1_77 = arith.constant 1 : index
    %c64_78 = arith.constant 64 : index
    %c0_79 = arith.constant 0 : index
    %195 = vector.load %arg3[%c1_77, %c64_78, %c0_79] : memref<2x96x128xbf16, #tpu.memory_space<vmem>>, vector<1x32x128xbf16>
    %196 = vector.shape_cast %195 : vector<1x32x128xbf16> to vector<32x128xbf16>
    %c1_80 = arith.constant 1 : index
    %c0_81 = arith.constant 0 : index
    %c0_82 = arith.constant 0 : index
    %197 = vector.load %arg4[%c1_80, %c0_81, %c0_82] : memref<2x8x128xf32, #tpu.memory_space<vmem>>, vector<1x1x32xf32>
    %198 = vector.shape_cast %197 : vector<1x1x32xf32> to vector<1x32xf32>
    %c1_83 = arith.constant 1 : index
    %c1_84 = arith.constant 1 : index
    %c0_85 = arith.constant 0 : index
    %199 = vector.load %arg4[%c1_83, %c1_84, %c0_85] : memref<2x8x128xf32, #tpu.memory_space<vmem>>, vector<1x1x32xf32>
    %200 = vector.shape_cast %199 : vector<1x1x32xf32> to vector<1x32xf32>
    %c1_86 = arith.constant 1 : index
    %c2_87 = arith.constant 2 : index
    %c0_88 = arith.constant 0 : index
    %201 = vector.load %arg4[%c1_86, %c2_87, %c0_88] : memref<2x8x128xf32, #tpu.memory_space<vmem>>, vector<1x1x96xf32>
    %202 = vector.shape_cast %201 : vector<1x1x96xf32> to vector<1x96xf32>
    %c1_89 = arith.constant 1 : index
    %c3_90 = arith.constant 3 : index
    %c0_91 = arith.constant 0 : index
    %203 = vector.load %arg4[%c1_89, %c3_90, %c0_91] : memref<2x8x128xf32, #tpu.memory_space<vmem>>, vector<1x1x32xf32>
    %204 = vector.shape_cast %203 : vector<1x1x32xf32> to vector<1x32xf32>
    %c1_92 = arith.constant 1 : index
    %c4_93 = arith.constant 4 : index
    %c0_94 = arith.constant 0 : index
    %205 = vector.load %arg4[%c1_92, %c4_93, %c0_94] : memref<2x8x128xf32, #tpu.memory_space<vmem>>, vector<1x1x32xf32>
    %206 = vector.shape_cast %205 : vector<1x1x32xf32> to vector<1x32xf32>
    %c1_95 = arith.constant 1 : index
    %c5_96 = arith.constant 5 : index
    %c0_97 = arith.constant 0 : index
    %207 = vector.load %arg4[%c1_95, %c5_96, %c0_97] : memref<2x8x128xf32, #tpu.memory_space<vmem>>, vector<1x1x32xf32>
    %208 = vector.shape_cast %207 : vector<1x1x32xf32> to vector<1x32xf32>
    %c1_98 = arith.constant 1 : index
    %c6_99 = arith.constant 6 : index
    %c0_100 = arith.constant 0 : index
    %209 = vector.load %arg4[%c1_98, %c6_99, %c0_100] : memref<2x8x128xf32, #tpu.memory_space<vmem>>, vector<1x1x128xf32>
    %210 = vector.shape_cast %209 : vector<1x1x128xf32> to vector<1x128xf32>
    %c1_101 = arith.constant 1 : index
    %c7_102 = arith.constant 7 : index
    %c0_103 = arith.constant 0 : index
    %211 = vector.load %arg4[%c1_101, %c7_102, %c0_103] : memref<2x8x128xf32, #tpu.memory_space<vmem>>, vector<1x1x32xf32>
    %212 = vector.shape_cast %211 : vector<1x1x32xf32> to vector<1x32xf32>
    %cst_104 = arith.constant dense<0.000000e+00> : vector<15xf32>
    %213 = vector.multi_reduction <add>, %188, %cst_104 [1] : vector<15x32xf32> to vector<15xf32>
    %214 = vector.shape_cast %213 : vector<15xf32> to vector<15x1xf32>
    %cst_105 = arith.constant 3.200000e+01 : f32
    %215 = vector.broadcast %cst_105 : f32 to vector<15x1xf32>
    %216 = arith.divf %214, %215 : vector<15x1xf32>
    %217 = arith.mulf %188, %188 : vector<15x32xf32>
    %cst_106 = arith.constant dense<0.000000e+00> : vector<15xf32>
    %218 = vector.multi_reduction <add>, %217, %cst_106 [1] : vector<15x32xf32> to vector<15xf32>
    %219 = vector.shape_cast %218 : vector<15xf32> to vector<15x1xf32>
    %cst_107 = arith.constant 3.200000e+01 : f32
    %220 = vector.broadcast %cst_107 : f32 to vector<15x1xf32>
    %221 = arith.divf %219, %220 : vector<15x1xf32>
    %222 = arith.mulf %216, %216 : vector<15x1xf32>
    %223 = arith.subf %221, %222 : vector<15x1xf32>
    %224 = vector.broadcast %216 : vector<15x1xf32> to vector<15x32xf32>
    %225 = arith.subf %188, %224 : vector<15x32xf32>
    %cst_108 = arith.constant 9.99999997E-7 : f32
    %226 = vector.broadcast %cst_108 : f32 to vector<15x1xf32>
    %227 = arith.addf %223, %226 : vector<15x1xf32>
    %228 = math.rsqrt %227 : vector<15x1xf32>
    %229 = vector.broadcast %228 : vector<15x1xf32> to vector<15x32xf32>
    %230 = arith.mulf %225, %229 : vector<15x32xf32>
    %231 = vector.broadcast %198 : vector<1x32xf32> to vector<15x32xf32>
    %232 = arith.mulf %230, %231 : vector<15x32xf32>
    %233 = vector.broadcast %200 : vector<1x32xf32> to vector<15x32xf32>
    %234 = arith.addf %232, %233 : vector<15x32xf32>
    %235 = arith.truncf %234 : vector<15x32xf32> to vector<15x32xbf16>
    %cst_109 = arith.constant dense<0.000000e+00> : vector<15x96xf32>
    %236 = tpu.matmul %235, %190, %cst_109 {dimension_numbers = #tpu.dot_dimension_numbers<[1], [0], [0], [1], [0, 0, 1, 1], [], []>} : vector<15x32xbf16>, vector<32x96xbf16>, vector<15x96xf32> -> vector<15x96xf32>
    %237 = vector.broadcast %202 : vector<1x96xf32> to vector<15x96xf32>
    %238 = arith.addf %236, %237 : vector<15x96xf32>
    %239 = vector.extract_strided_slice %238 {offsets = [0, 0], sizes = [15, 8], strides = [1, 1]} : vector<15x96xf32> to vector<15x8xf32>
    %240 = arith.truncf %239 : vector<15x8xf32> to vector<15x8xbf16>
    %241 = vector.extract_strided_slice %238 {offsets = [0, 32], sizes = [15, 8], strides = [1, 1]} : vector<15x96xf32> to vector<15x8xf32>
    %242 = arith.truncf %241 : vector<15x8xf32> to vector<15x8xbf16>
    %243 = vector.extract_strided_slice %238 {offsets = [0, 64], sizes = [15, 8], strides = [1, 1]} : vector<15x96xf32> to vector<15x8xf32>
    %244 = arith.truncf %243 : vector<15x8xf32> to vector<15x8xbf16>
    %cst_110 = arith.constant dense<0.000000e+00> : vector<15x15xf32>
    %245 = tpu.matmul %240, %242, %cst_110 {dimension_numbers = #tpu.dot_dimension_numbers<[1], [1], [0], [0], [0, 0, 1, 0], [], []>} : vector<15x8xbf16>, vector<15x8xbf16>, vector<15x15xf32> -> vector<15x15xf32>
    %cst_111 = arith.constant 0.353553385 : f32
    %246 = vector.broadcast %cst_111 : f32 to vector<15x15xf32>
    %247 = arith.mulf %245, %246 : vector<15x15xf32>
    %cst_112 = arith.constant dense<0xFF800000> : vector<15xf32>
    %248 = vector.multi_reduction <maximumf>, %247, %cst_112 [1] : vector<15x15xf32> to vector<15xf32>
    %249 = vector.shape_cast %248 : vector<15xf32> to vector<15x1xf32>
    %250 = vector.broadcast %249 : vector<15x1xf32> to vector<15x15xf32>
    %251 = arith.subf %247, %250 : vector<15x15xf32>
    %252 = math.exp %251 : vector<15x15xf32>
    %cst_113 = arith.constant dense<0.000000e+00> : vector<15xf32>
    %253 = vector.multi_reduction <add>, %252, %cst_113 [1] : vector<15x15xf32> to vector<15xf32>
    %254 = vector.shape_cast %253 : vector<15xf32> to vector<15x1xf32>
    %255 = tpu.reciprocal %254 {approx = true} : vector<15x1xf32> -> vector<15x1xf32>
    %256 = vector.broadcast %255 : vector<15x1xf32> to vector<15x15xf32>
    %257 = arith.mulf %252, %256 : vector<15x15xf32>
    %258 = arith.truncf %257 : vector<15x15xf32> to vector<15x15xbf16>
    %cst_114 = arith.constant dense<0.000000e+00> : vector<15x8xf32>
    %259 = tpu.matmul %258, %244, %cst_114 {dimension_numbers = #tpu.dot_dimension_numbers<[1], [0], [0], [1], [0, 0, 1, 1], [], []>} : vector<15x15xbf16>, vector<15x8xbf16>, vector<15x8xf32> -> vector<15x8xf32>
    %260 = vector.extract_strided_slice %238 {offsets = [0, 8], sizes = [15, 8], strides = [1, 1]} : vector<15x96xf32> to vector<15x8xf32>
    %261 = arith.truncf %260 : vector<15x8xf32> to vector<15x8xbf16>
    %262 = vector.extract_strided_slice %238 {offsets = [0, 40], sizes = [15, 8], strides = [1, 1]} : vector<15x96xf32> to vector<15x8xf32>
    %263 = arith.truncf %262 : vector<15x8xf32> to vector<15x8xbf16>
    %264 = vector.extract_strided_slice %238 {offsets = [0, 72], sizes = [15, 8], strides = [1, 1]} : vector<15x96xf32> to vector<15x8xf32>
    %265 = arith.truncf %264 : vector<15x8xf32> to vector<15x8xbf16>
    %cst_115 = arith.constant dense<0.000000e+00> : vector<15x15xf32>
    %266 = tpu.matmul %261, %263, %cst_115 {dimension_numbers = #tpu.dot_dimension_numbers<[1], [1], [0], [0], [0, 0, 1, 0], [], []>} : vector<15x8xbf16>, vector<15x8xbf16>, vector<15x15xf32> -> vector<15x15xf32>
    %cst_116 = arith.constant 0.353553385 : f32
    %267 = vector.broadcast %cst_116 : f32 to vector<15x15xf32>
    %268 = arith.mulf %266, %267 : vector<15x15xf32>
    %cst_117 = arith.constant dense<0xFF800000> : vector<15xf32>
    %269 = vector.multi_reduction <maximumf>, %268, %cst_117 [1] : vector<15x15xf32> to vector<15xf32>
    %270 = vector.shape_cast %269 : vector<15xf32> to vector<15x1xf32>
    %271 = vector.broadcast %270 : vector<15x1xf32> to vector<15x15xf32>
    %272 = arith.subf %268, %271 : vector<15x15xf32>
    %273 = math.exp %272 : vector<15x15xf32>
    %cst_118 = arith.constant dense<0.000000e+00> : vector<15xf32>
    %274 = vector.multi_reduction <add>, %273, %cst_118 [1] : vector<15x15xf32> to vector<15xf32>
    %275 = vector.shape_cast %274 : vector<15xf32> to vector<15x1xf32>
    %276 = tpu.reciprocal %275 {approx = true} : vector<15x1xf32> -> vector<15x1xf32>
    %277 = vector.broadcast %276 : vector<15x1xf32> to vector<15x15xf32>
    %278 = arith.mulf %273, %277 : vector<15x15xf32>
    %279 = arith.truncf %278 : vector<15x15xf32> to vector<15x15xbf16>
    %cst_119 = arith.constant dense<0.000000e+00> : vector<15x8xf32>
    %280 = tpu.matmul %279, %265, %cst_119 {dimension_numbers = #tpu.dot_dimension_numbers<[1], [0], [0], [1], [0, 0, 1, 1], [], []>} : vector<15x15xbf16>, vector<15x8xbf16>, vector<15x8xf32> -> vector<15x8xf32>
    %281 = vector.extract_strided_slice %238 {offsets = [0, 16], sizes = [15, 8], strides = [1, 1]} : vector<15x96xf32> to vector<15x8xf32>
    %282 = arith.truncf %281 : vector<15x8xf32> to vector<15x8xbf16>
    %283 = vector.extract_strided_slice %238 {offsets = [0, 48], sizes = [15, 8], strides = [1, 1]} : vector<15x96xf32> to vector<15x8xf32>
    %284 = arith.truncf %283 : vector<15x8xf32> to vector<15x8xbf16>
    %285 = vector.extract_strided_slice %238 {offsets = [0, 80], sizes = [15, 8], strides = [1, 1]} : vector<15x96xf32> to vector<15x8xf32>
    %286 = arith.truncf %285 : vector<15x8xf32> to vector<15x8xbf16>
    %cst_120 = arith.constant dense<0.000000e+00> : vector<15x15xf32>
    %287 = tpu.matmul %282, %284, %cst_120 {dimension_numbers = #tpu.dot_dimension_numbers<[1], [1], [0], [0], [0, 0, 1, 0], [], []>} : vector<15x8xbf16>, vector<15x8xbf16>, vector<15x15xf32> -> vector<15x15xf32>
    %cst_121 = arith.constant 0.353553385 : f32
    %288 = vector.broadcast %cst_121 : f32 to vector<15x15xf32>
    %289 = arith.mulf %287, %288 : vector<15x15xf32>
    %cst_122 = arith.constant dense<0xFF800000> : vector<15xf32>
    %290 = vector.multi_reduction <maximumf>, %289, %cst_122 [1] : vector<15x15xf32> to vector<15xf32>
    %291 = vector.shape_cast %290 : vector<15xf32> to vector<15x1xf32>
    %292 = vector.broadcast %291 : vector<15x1xf32> to vector<15x15xf32>
    %293 = arith.subf %289, %292 : vector<15x15xf32>
    %294 = math.exp %293 : vector<15x15xf32>
    %cst_123 = arith.constant dense<0.000000e+00> : vector<15xf32>
    %295 = vector.multi_reduction <add>, %294, %cst_123 [1] : vector<15x15xf32> to vector<15xf32>
    %296 = vector.shape_cast %295 : vector<15xf32> to vector<15x1xf32>
    %297 = tpu.reciprocal %296 {approx = true} : vector<15x1xf32> -> vector<15x1xf32>
    %298 = vector.broadcast %297 : vector<15x1xf32> to vector<15x15xf32>
    %299 = arith.mulf %294, %298 : vector<15x15xf32>
    %300 = arith.truncf %299 : vector<15x15xf32> to vector<15x15xbf16>
    %cst_124 = arith.constant dense<0.000000e+00> : vector<15x8xf32>
    %301 = tpu.matmul %300, %286, %cst_124 {dimension_numbers = #tpu.dot_dimension_numbers<[1], [0], [0], [1], [0, 0, 1, 1], [], []>} : vector<15x15xbf16>, vector<15x8xbf16>, vector<15x8xf32> -> vector<15x8xf32>
    %302 = vector.extract_strided_slice %238 {offsets = [0, 24], sizes = [15, 8], strides = [1, 1]} : vector<15x96xf32> to vector<15x8xf32>
    %303 = arith.truncf %302 : vector<15x8xf32> to vector<15x8xbf16>
    %304 = vector.extract_strided_slice %238 {offsets = [0, 56], sizes = [15, 8], strides = [1, 1]} : vector<15x96xf32> to vector<15x8xf32>
    %305 = arith.truncf %304 : vector<15x8xf32> to vector<15x8xbf16>
    %306 = vector.extract_strided_slice %238 {offsets = [0, 88], sizes = [15, 8], strides = [1, 1]} : vector<15x96xf32> to vector<15x8xf32>
    %307 = arith.truncf %306 : vector<15x8xf32> to vector<15x8xbf16>
    %cst_125 = arith.constant dense<0.000000e+00> : vector<15x15xf32>
    %308 = tpu.matmul %303, %305, %cst_125 {dimension_numbers = #tpu.dot_dimension_numbers<[1], [1], [0], [0], [0, 0, 1, 0], [], []>} : vector<15x8xbf16>, vector<15x8xbf16>, vector<15x15xf32> -> vector<15x15xf32>
    %cst_126 = arith.constant 0.353553385 : f32
    %309 = vector.broadcast %cst_126 : f32 to vector<15x15xf32>
    %310 = arith.mulf %308, %309 : vector<15x15xf32>
    %cst_127 = arith.constant dense<0xFF800000> : vector<15xf32>
    %311 = vector.multi_reduction <maximumf>, %310, %cst_127 [1] : vector<15x15xf32> to vector<15xf32>
    %312 = vector.shape_cast %311 : vector<15xf32> to vector<15x1xf32>
    %313 = vector.broadcast %312 : vector<15x1xf32> to vector<15x15xf32>
    %314 = arith.subf %310, %313 : vector<15x15xf32>
    %315 = math.exp %314 : vector<15x15xf32>
    %cst_128 = arith.constant dense<0.000000e+00> : vector<15xf32>
    %316 = vector.multi_reduction <add>, %315, %cst_128 [1] : vector<15x15xf32> to vector<15xf32>
    %317 = vector.shape_cast %316 : vector<15xf32> to vector<15x1xf32>
    %318 = tpu.reciprocal %317 {approx = true} : vector<15x1xf32> -> vector<15x1xf32>
    %319 = vector.broadcast %318 : vector<15x1xf32> to vector<15x15xf32>
    %320 = arith.mulf %315, %319 : vector<15x15xf32>
    %321 = arith.truncf %320 : vector<15x15xf32> to vector<15x15xbf16>
    %cst_129 = arith.constant dense<0.000000e+00> : vector<15x8xf32>
    %322 = tpu.matmul %321, %307, %cst_129 {dimension_numbers = #tpu.dot_dimension_numbers<[1], [0], [0], [1], [0, 0, 1, 1], [], []>} : vector<15x15xbf16>, vector<15x8xbf16>, vector<15x8xf32> -> vector<15x8xf32>
    %323 = tpu.concatenate %259, %280, %301, %322 in 1 : vector<15x8xf32>, vector<15x8xf32>, vector<15x8xf32>, vector<15x8xf32> -> vector<15x32xf32>
    %324 = arith.truncf %323 : vector<15x32xf32> to vector<15x32xbf16>
    %cst_130 = arith.constant dense<0.000000e+00> : vector<15x32xf32>
    %325 = tpu.matmul %324, %192, %cst_130 {dimension_numbers = #tpu.dot_dimension_numbers<[1], [0], [0], [1], [0, 0, 1, 1], [], []>} : vector<15x32xbf16>, vector<32x32xbf16>, vector<15x32xf32> -> vector<15x32xf32>
    %326 = arith.addf %188, %325 : vector<15x32xf32>
    %327 = vector.broadcast %204 : vector<1x32xf32> to vector<15x32xf32>
    %328 = arith.addf %326, %327 : vector<15x32xf32>
    %cst_131 = arith.constant dense<0.000000e+00> : vector<15xf32>
    %329 = vector.multi_reduction <add>, %328, %cst_131 [1] : vector<15x32xf32> to vector<15xf32>
    %330 = vector.shape_cast %329 : vector<15xf32> to vector<15x1xf32>
    %cst_132 = arith.constant 3.200000e+01 : f32
    %331 = vector.broadcast %cst_132 : f32 to vector<15x1xf32>
    %332 = arith.divf %330, %331 : vector<15x1xf32>
    %333 = arith.mulf %328, %328 : vector<15x32xf32>
    %cst_133 = arith.constant dense<0.000000e+00> : vector<15xf32>
    %334 = vector.multi_reduction <add>, %333, %cst_133 [1] : vector<15x32xf32> to vector<15xf32>
    %335 = vector.shape_cast %334 : vector<15xf32> to vector<15x1xf32>
    %cst_134 = arith.constant 3.200000e+01 : f32
    %336 = vector.broadcast %cst_134 : f32 to vector<15x1xf32>
    %337 = arith.divf %335, %336 : vector<15x1xf32>
    %338 = arith.mulf %332, %332 : vector<15x1xf32>
    %339 = arith.subf %337, %338 : vector<15x1xf32>
    %340 = vector.broadcast %332 : vector<15x1xf32> to vector<15x32xf32>
    %341 = arith.subf %328, %340 : vector<15x32xf32>
    %cst_135 = arith.constant 9.99999997E-7 : f32
    %342 = vector.broadcast %cst_135 : f32 to vector<15x1xf32>
    %343 = arith.addf %339, %342 : vector<15x1xf32>
    %344 = math.rsqrt %343 : vector<15x1xf32>
    %345 = vector.broadcast %344 : vector<15x1xf32> to vector<15x32xf32>
    %346 = arith.mulf %341, %345 : vector<15x32xf32>
    %347 = vector.broadcast %206 : vector<1x32xf32> to vector<15x32xf32>
    %348 = arith.mulf %346, %347 : vector<15x32xf32>
    %349 = vector.broadcast %208 : vector<1x32xf32> to vector<15x32xf32>
    %350 = arith.addf %348, %349 : vector<15x32xf32>
    %351 = arith.truncf %350 : vector<15x32xf32> to vector<15x32xbf16>
    %cst_136 = arith.constant dense<0.000000e+00> : vector<15x128xf32>
    %352 = tpu.matmul %351, %194, %cst_136 {dimension_numbers = #tpu.dot_dimension_numbers<[1], [0], [0], [1], [0, 0, 1, 1], [], []>} : vector<15x32xbf16>, vector<32x128xbf16>, vector<15x128xf32> -> vector<15x128xf32>
    %353 = vector.broadcast %210 : vector<1x128xf32> to vector<15x128xf32>
    %354 = arith.addf %352, %353 : vector<15x128xf32>
    %355 = arith.mulf %354, %354 : vector<15x128xf32>
    %356 = arith.mulf %354, %355 : vector<15x128xf32>
    %cst_137 = arith.constant 4.471500e-02 : f32
    %357 = vector.broadcast %cst_137 : f32 to vector<15x128xf32>
    %358 = arith.mulf %357, %356 : vector<15x128xf32>
    %359 = arith.addf %354, %358 : vector<15x128xf32>
    %cst_138 = arith.constant 0.797884583 : f32
    %360 = vector.broadcast %cst_138 : f32 to vector<15x128xf32>
    %361 = arith.mulf %360, %359 : vector<15x128xf32>
    %362 = math.tanh %361 : vector<15x128xf32>
    %cst_139 = arith.constant 1.000000e+00 : f32
    %363 = vector.broadcast %cst_139 : f32 to vector<15x128xf32>
    %364 = arith.addf %363, %362 : vector<15x128xf32>
    %cst_140 = arith.constant 5.000000e-01 : f32
    %365 = vector.broadcast %cst_140 : f32 to vector<15x128xf32>
    %366 = arith.mulf %365, %364 : vector<15x128xf32>
    %367 = arith.mulf %354, %366 : vector<15x128xf32>
    %368 = arith.truncf %367 : vector<15x128xf32> to vector<15x128xbf16>
    %cst_141 = arith.constant dense<0.000000e+00> : vector<15x32xf32>
    %369 = tpu.matmul %368, %196, %cst_141 {dimension_numbers = #tpu.dot_dimension_numbers<[1], [1], [0], [0], [0, 0, 1, 0], [], []>} : vector<15x128xbf16>, vector<32x128xbf16>, vector<15x32xf32> -> vector<15x32xf32>
    %370 = arith.addf %328, %369 : vector<15x32xf32>
    %371 = vector.broadcast %212 : vector<1x32xf32> to vector<15x32xf32>
    %372 = arith.addf %370, %371 : vector<15x32xf32>
    %cst_142 = arith.constant 0.000000e+00 : f32
    %373 = vector.broadcast %cst_142 : f32 to vector<1x32xf32>
    %374 = tpu.concatenate %372, %373 in 0 : vector<15x32xf32>, vector<1x32xf32> -> vector<16x32xf32>
    %375 = vector.extract_strided_slice %374 {offsets = [0, 0], sizes = [4, 32], strides = [1, 1]} : vector<16x32xf32> to vector<4x32xf32>
    %376 = vector.extract_strided_slice %374 {offsets = [4, 0], sizes = [4, 32], strides = [1, 1]} : vector<16x32xf32> to vector<4x32xf32>
    %377 = vector.extract_strided_slice %374 {offsets = [8, 0], sizes = [4, 32], strides = [1, 1]} : vector<16x32xf32> to vector<4x32xf32>
    %378 = vector.extract_strided_slice %374 {offsets = [12, 0], sizes = [4, 32], strides = [1, 1]} : vector<16x32xf32> to vector<4x32xf32>
    %379 = tpu.concatenate %375, %376, %377, %378 in 1 : vector<4x32xf32>, vector<4x32xf32>, vector<4x32xf32>, vector<4x32xf32> -> vector<4x128xf32>
    %c0_143 = arith.constant 0 : index
    %c0_144 = arith.constant 0 : index
    %c0_145 = arith.constant 0 : index
    %380 = vector.load %arg5[%c0_143, %c0_144, %c0_145] : memref<1x4x128xf32, #tpu.memory_space<vmem>>, vector<1x4x128xf32>
    %381 = vector.shape_cast %380 : vector<1x4x128xf32> to vector<4x128xf32>
    %382 = vector.shape_cast %379 : vector<4x128xf32> to vector<1x4x128xf32>
    tpu.vector_store %arg5[%c0_143, %c0_144, %c0_145], %382 {strides = array<i32>} : memref<1x4x128xf32, #tpu.memory_space<vmem>>, vector<1x4x128xf32>,
    return
  }
  func.func @transform_0(%arg0: i32) -> (i32, i32, i32) {
    %c0_i32 = arith.constant 0 : i32
    %c0_i32_0 = arith.constant 0 : i32
    %c0_i32_1 = arith.constant 0 : i32
    return %arg0, %c0_i32, %c0_i32_0 : i32, i32, i32
  }
  func.func @transform_1(%arg0: i32) -> (i32, i32) {
    %c0_i32 = arith.constant 0 : i32
    %c0_i32_0 = arith.constant 0 : i32
    %c0_i32_1 = arith.constant 0 : i32
    return %c0_i32, %c0_i32_0 : i32, i32
  }
  func.func @transform_2(%arg0: i32) -> (i32, i32, i32) {
    %c0_i32 = arith.constant 0 : i32
    %c0_i32_0 = arith.constant 0 : i32
    %c0_i32_1 = arith.constant 0 : i32
    %c0_i32_2 = arith.constant 0 : i32
    return %c0_i32, %c0_i32_0, %c0_i32_1 : i32, i32, i32
  }
  func.func @transform_3(%arg0: i32) -> (i32, i32, i32) {
    %c0_i32 = arith.constant 0 : i32
    %c0_i32_0 = arith.constant 0 : i32
    %c0_i32_1 = arith.constant 0 : i32
    %c0_i32_2 = arith.constant 0 : i32
    return %c0_i32, %c0_i32_0, %c0_i32_1 : i32, i32, i32
  }
  func.func @transform_4(%arg0: i32) -> (i32, i32, i32) {
    %c0_i32 = arith.constant 0 : i32
    %c0_i32_0 = arith.constant 0 : i32
    %c0_i32_1 = arith.constant 0 : i32
    return %arg0, %c0_i32, %c0_i32_0 : i32, i32, i32
  }
}

</mosaic_0001>

<bundles_post_ra>
// kernel: masked_vit_forward.1
= control target key start
LH: loop header
LB: loop body
LE: loop exit
PB: predicated region body
PF: predicated region fallthrough
CT: control target
= control target key end

     0   :  { %s1867_s15 = smov 0   ;;  %s2265_s0 = inlined_call_operand.vmem [shape: f32[2,15,80], index: 0, kind: input, shape index: {}]   ;;  %s2266_s1 = inlined_call_operand.vmem [shape: bf16[80,32], index: 1, kind: input, shape index: {}]   ;;  %s2267_s2 = inlined_call_operand.vmem [shape: bf16[2,96,128], index: 2, kind: input, shape index: {}]   ;;  %s2268_s3 = inlined_call_operand.vmem [shape: f32[2,8,128], index: 3, kind: input, shape index: {}]   ;;  %s2269_s4 = inlined_call_operand.vmem [shape: f32[2,4,128], index: 4, kind: output, shape index: {}]  }
   0x1 LB: > { %s1517_s16 = sadd.s32 4294967295, %s1823_s15   ;;  %p1521_p0 = scmp.ge.s32.totalorder %s1823_s15, 1  ;;  %s1823_s15 = sphi %s1867_s15, %s14_s15  }
   0x2   : > { %p162_p1 = scmp.lt.s32.totalorder %s1823_s15, 3 }
   0x4   : > { %p163_p2 = pnand %p1521_p0, %p162_p1 }
   0x5   : > { %p187_p3 = scmp.lt.s32.totalorder (!%p163_p2), %s1517_s16, 1  ;;  %s1826_s17 = smov (!%p163_p2), 64  }
   0x6   : > { %166 = sbr.rel (%p163_p2) target bundleno = 4112 (0x1010), region = 36  ;;  %s1827_s18 = smov (!%p163_p2), 96  }
   0x7   : > { %s1829_s19 = smov (!%p163_p2), 80   ;;  %s1830_s20 = smov (!%p163_p2), 88  }
   0x8   : > { %s1831_s21 = smov (!%p163_p2), 120   ;;  %s1832_s22 = smov (!%p163_p2), 72  }
   0x9   : > { %s1834_s24 = smov (!%p163_p2), 104   ;;  %s1835_s25 = smov (!%p163_p2), 56  }
   0xa   : > { %s1836_s26 = smov (!%p163_p2), 48   ;;  %s1837_s27 = smov (!%p163_p2), 40  }
   0xb   : > { %v1643_v0 = vld [vmem:[%s2266_s1 + $0x20] sm:$0xff]  ;;  %v1642_v1 = vld [vmem:[%s2266_s1 + $0x18] sm:$0xff]  ;;  %s2271_s16 = smov (!%p187_p3, %s1517_s16), 1  ;;  %v1641_v2 = vld [vmem:[%s2266_s1 + $0x10] sm:$0xff]  ;;  %vm240_vm0 = vcmask 654336   ;;  %vm278_vm1 = vcmask 261120  }
   0xc   : > { %247 = vmatpush.bf16.msra.mxu0 %v1643_v0  ;;  %s1638_s23 = sshll.u32 %s2271_s16, 4  ;;  %v1640_v3 = vld [vmem:[%s2266_s1 + $0x8] sm:$0xff]  ;;  %v1639_v4 = vld [vmem:[%s2266_s1] sm:$0xff]  ;;  %vm282_vm2 = vcmask 260096   ;;  %v1825_v16 = vmov 32.0   ;;  %vm376_vm10 = vcmask 64512  }
   0xd   : > { %s191_s28 = scalar_lea.vmem %s2265_s0, %s1638_s23  ;;  %1727 = vrcp.f32 %v1825_v16  ;;  %v1916_v26 = vld [vmem:[%s2267_s2 + $0x8] sm:$0xff]  ;;  %v1923_v29 = vld [vmem:[%s2267_s2] sm:$0xff]  ;;  %vm429_vm11 = vcmask 1046528   ;;  %vm430_vm12 = vcmask 1047552   ;;  %vm399_vm13 = vcmask 121856   ;;  %s1833_s23 = smov 112  }
   0xe   : > { %v197_v5 = vld [vmem:[%s191_s28] sm:$0xff]  ;;  %v198_v6 = vld [vmem:[%s191_s28 + $0x8] sm:$0x7f]  ;;  %364 = vmatpush.bf16.msra.mxu1 %v1916_v26  ;;  %vm403_vm14 = vcmask 120832   ;;  %s1838_s28 = smov 32   ;;  %s1839_s29 = smov 8  }
   0xf   : > { %v199_v7 = vpack.c.bf16 %v198_v6, %v197_v5  ;;  %v1711_v53 = vld [vmem:[%s2268_s3] ss:$0 sm:$0xff]  ;;  %v1712_v59 = vld [vmem:[%s2268_s3 + $0x1] ss:$0 sm:$0xff]  ;;  %s1840_s30 = smov 16   ;;  %s1841_s5 = smov 24  }
  0x10   : > { %248 = vmatpush.bf16.msra.mxu0 %v1642_v1  ;;  %v1713_v1 = vld [vmem:[%s2268_s3 + $0x2] ss:$0 sm:$0xff]  ;;  %vm689_vm15 = vcmask 130048   ;;  %s1524_s13 = sshll.u32 %s2271_s16, 2 }
  0x11   : > { %s195_s6 = scalar_lea.vmem %s2269_s4, %s1524_s13 }
  0x12   : > { %365 = vmatpush.bf16.msra.mxu1 %v1923_v29 }
  0x13   : > { %v1728_v17 = vpop.eup %1727 }
  0x14   : > { %249 = vmatpush.bf16.msra.mxu0 %v1641_v2  ;;  %v287_v18 = vmul.f32 32.0, %v1728_v17  ;;  %vm291_vm3 = vweird.f32 %v1728_v17 }
  0x16   : > { %v288_v19 = vsub.f32 1.0, %v287_v18 }
  0x18   : > { %250 = vmatpush.bf16.msra.mxu0 %v1640_v3  ;;  %v289_v20 = vmul.f32 %v1728_v17, %v288_v19 }
  0x1a   : > { %v290_v21 = vadd.f32 %v1728_v17, %v289_v20 }
  0x1c   : > { %251 = vmatpush.bf16.msra.mxu0 %v1639_v4  ;;  %v1910_v22 = vsel %vm291_vm3, %v1728_v17, %v290_v21 }
  0x1f   : > { %1545 = vmatmul.msk.bf16.vlgmr.msra.gmra.mxu0 %vm240_vm0, %v199_v7  ;;  %vm692_vm0 = vcmask 195584  }
  0x9c   : > { %v1896_v8 = vpop.f32.mrf.mxu0 }
  0x9d   : > { %v279_v9 = vsel %vm278_vm1, %v1896_v8, 0.0  ;;  %v295_v10 = vmul.f32 %v1896_v8, %v1896_v8 }
  0x9e   : > { %280 = vadd.xlane.f32.xlu0 %v279_v9  ;;  %v1828_v9 = vmov 65535  }
  0x9f   : > { %v297_v11 = vsel %vm278_vm1, %v295_v10, 0.0  ;;  %v431_v10 = vsel %vm429_vm11, 4294967295, %v1828_v9 }
  0xa0   : > { %298 = vadd.xlane.f32.xlu1 %v297_v11  ;;  %v1950_v11 = vsel %vm430_vm12, %v431_v10, 0 }
  0xa4   : > { %v1903_v12 = vpop.f32.mrf.mxu0 }
  0xa5   : > { %v283_v13 = vsel %vm282_vm2, %v1903_v12, 0.0  ;;  %v296_v14 = vmul.f32 %v1903_v12, %v1903_v12 }
  0xa6   : > { %284 = vadd.xlane.f32.xlu0 %v283_v13 }
  0xa7   : > { %v300_v15 = vsel %vm282_vm2, %v296_v14, 0.0 }
  0xa8   : > { %301 = vadd.xlane.f32.xlu1 %v300_v15 }
 0x111   : > { %v281_v23 = vpop.xlane.xlu0 %280 }
 0x112   : > { %v293_v24 = vmul.f32 %v1910_v22, %v281_v23 }
 0x113   : > { %v299_v25 = vpop.xlane.xlu1 %298 }
 0x114   : > { %v305_v27 = vmul.f32 %v293_v24, %v293_v24  ;;  %v303_v28 = vmul.f32 %v299_v25, %v1910_v22  ;;  %v309_v50 = vsub.f32 %v1896_v8, %v293_v24 }
 0x116   : > { %v307_v30 = vsub.f32 %v303_v28, %v305_v27 }
 0x118   : > { %v311_v31 = vadd.f32 1e-06, %v307_v30 }
 0x119   : > { %v285_v32 = vpop.xlane.xlu0 %284 }
 0x11a   : > { %1729 = vrsqrt.f32 %v311_v31  ;;  %v294_v33 = vmul.f32 %v1910_v22, %v285_v32  ;;  %vm319_vm5 = vweird.f32 %v311_v31 }
 0x11b   : > { %v302_v34 = vpop.xlane.xlu1 %301 }
 0x11c   : > { %v306_v35 = vmul.f32 %v294_v33, %v294_v33  ;;  %v304_v36 = vmul.f32 %v302_v34, %v1910_v22  ;;  %v310_v55 = vsub.f32 %v1903_v12, %v294_v33 }
 0x11e   : > { %v308_v37 = vsub.f32 %v304_v36, %v306_v35 }
 0x120   : > { %v1730_v38 = vpop.eup %1729  ;;  %v312_v39 = vadd.f32 1e-06, %v308_v37 }
 0x121   : > { %v314_v40 = vmul.f32 %v1730_v38, %v311_v31  ;;  %vm320_vm4 = vweird.f32 %v1730_v38 }
 0x122   : > { %1731 = vrsqrt.f32 %v312_v39  ;;  %vm321_vm6 = vmor %vm319_vm5, %vm320_vm4  ;;  %vm329_vm8 = vweird.f32 %v312_v39 }
 0x123   : > { %v315_v41 = vmul.f32 %v1730_v38, %v314_v40 }
 0x125   : > { %v316_v42 = vmul.f32 0.5, %v315_v41 }
 0x127   : > { %v317_v43 = vsub.f32 1.5, %v316_v42 }
 0x128   : > { %v1732_v44 = vpop.eup %1731 }
 0x129   : > { %v318_v45 = vmul.f32 %v1730_v38, %v317_v43  ;;  %v324_v46 = vmul.f32 %v1732_v44, %v312_v39  ;;  %vm330_vm7 = vweird.f32 %v1732_v44 }
 0x12a   : > { %vm331_vm9 = vmor %vm329_vm8, %vm330_vm7 }
 0x12b   : > { %v325_v47 = vmul.f32 %v1732_v44, %v324_v46  ;;  %v322_v48 = vsel %vm321_vm6, %v1730_v38, %v318_v45 }
 0x12c   : > { %v333_v52 = vmul.f32 %v322_v48, %v309_v50 }
 0x12d   : > { %v326_v49 = vmul.f32 0.5, %v325_v47 }
 0x12e   : > { %v336_v58 = vmul.f32 %v1711_v53, %v333_v52 }
 0x12f   : > { %v327_v51 = vsub.f32 1.5, %v326_v49 }
 0x130   : > { %v339_v61 = vadd.f32 %v1712_v59, %v336_v58 }
 0x131   : > { %v328_v54 = vmul.f32 %v1732_v44, %v327_v51 }
 0x133   : > { %v332_v56 = vsel %vm331_vm9, %v1732_v44, %v328_v54 }
 0x134   : > { %v334_v57 = vmul.f32 %v332_v56, %v310_v55 }
 0x136   : > { %v337_v60 = vmul.f32 %v1711_v53, %v334_v57 }
 0x138   : > { %v340_v62 = vadd.f32 %v1712_v59, %v337_v60 }
 0x13a   : > { %v341_v63 = vpack.c.bf16 %v340_v62, %v339_v61 }
 0x13c   : > { %1554 = vmatmul.msk.bf16.vlgmr.msra.gmra.mxu1 %vm278_vm1, %v341_v63 }
 0x1b9   : > { %v367_v0 = vpop.f32.mrf.mxu1 }
 0x1ba   : > { %v368_v3 = vadd.f32 %v1713_v1, %v367_v0 }
 0x1c1   : > { %v369_v2 = vpop.f32.mrf.mxu1 }
 0x1c2   : > { %v370_v4 = vadd.f32 %v1713_v1, %v369_v2 }
 0x1c4   : > { %v1940_v5 = vpack.c.bf16 %v370_v4, %v368_v3 }
 0x1c6   : > { %424 = vrot.lane.b32.xlu1 %v1940_v5, %s1826_s17  ;;  %374 = vrot.lane.b32.xlu2 %v1940_v5, %s1827_s18 }
 0x220   : > { %v375_v6 = vpop.permute.xlu2 %374 }
 0x221   : > { %v381_v7 = vsel %vm376_vm10, %v375_v6, 0 }
 0x222   : > { %390 = vmatpush.bf16.xpose.msra.mxu2 %v381_v7 }
 0x229   : > { %1555 = vmatmul.msk.bf16.vlgmr.msra.gmra.mxu2 %vm376_vm10, %v1940_v5 }
 0x238   : > { %v425_v13 = vpop.permute.xlu1 %424 }
 0x239   : > { %v434_v14 = vand.u32 %v1950_v11, %v425_v13 }
 0x23b   : > { %443 = vmatpush.bf16.msra.mxu3 %v434_v14 }
 0x2ac   : > { %v392_v15 = vpop.f32.mrf.mxu2 }
 0x2ad   : > { %v397_v16 = vmul.f32 0.35355338, %v392_v15 }
 0x2af   : > { %v400_v17 = vsel %vm399_vm13, %v397_v16, -inf }
 0x2b0   : > { %401 = vmax.xlane.f32.xlu2 %v400_v17 }
 0x2b4   : > { %v394_v18 = vpop.f32.mrf.mxu2 }
 0x2b5   : > { %v398_v19 = vmul.f32 0.35355338, %v394_v18 }
 0x2b7   : > { %v404_v20 = vsel %vm403_vm14, %v398_v19, -inf }
 0x2b8   : > { %405 = vmax.xlane.f32.xlu0 %v404_v20 }
 0x2c8   : > { %523 = vrot.lane.b32.xlu2 %v1940_v5, %s1829_s19 }
 0x2cc   : > { %452 = vrot.lane.b32.xlu0 %v1940_v5, %s1830_s20 }
 0x323   : > { %v402_v21 = vpop.xlane.xlu2 %401 }
 0x324   : > { %v407_v23 = vsub.f32 %v397_v16, %v402_v21 }
 0x326   : > { %v409_v24 = vmul.f32 1.442695, %v407_v23 }
 0x328   : > { %1733 = vpow2.f32 %v409_v24 }
 0x32b   : > { %v524_v25 = vpop.permute.xlu2 %523  ;;  %v406_v27 = vpop.xlane.xlu0 %405 }
 0x32c   : > { %v408_v28 = vsub.f32 %v398_v19, %v406_v27  ;;  %v529_v30 = vsel %vm376_vm10, %v524_v25, 0 }
 0x32d   : > { %538 = vmatpush.bf16.xpose.msrb.mxu2 %v529_v30 }
 0x32e   : > { %v1734_v31 = vpop.eup %1733  ;;  %v411_v32 = vmul.f32 1.442695, %v408_v28 }
 0x32f   : > { %v413_v33 = vsel %vm399_vm13, %v1734_v31, 0.0 }
 0x330   : > { %1735 = vpow2.f32 %v411_v32  ;;  %414 = vadd.xlane.f32.xlu1 %v413_v33 }
 0x336   : > { %v1736_v34 = vpop.eup %1735 }
 0x337   : > { %v416_v35 = vsel %vm403_vm14, %v1736_v34, 0.0 }
 0x338   : > { %417 = vadd.xlane.f32.xlu0 %v416_v35 }
 0x33e   : > { %v453_v36 = vpop.permute.xlu0 %452 }
 0x33f   : > { %v458_v37 = vsel %vm376_vm10, %v453_v36, 0 }
 0x340   : > { %467 = vmatpush.bf16.xpose.msrb.mxu3 %v458_v37 }
 0x349   : > { %450 = vrot.lane.b32.xlu1 %v1940_v5, %s1831_s21 }
 0x34c   : > { %594 = vrot.lane.b32.xlu0 %v1940_v5, %s1832_s22 }
 0x351   : > { %521 = vrot.lane.b32.xlu1 %v1940_v5, %s1833_s23 }
 0x354   : > { %592 = vrot.lane.b32.xlu0 %v1940_v5, %s1834_s24 }
 0x3a3   : > { %v415_v38 = vpop.xlane.xlu1 %414 }
 0x3a4   : > { %1737 = vrcp.f32 %v415_v38 }
 0x3aa   : > { %v1738_v40 = vpop.eup %1737 }
 0x3ab   : > { %v418_v39 = vpop.xlane.xlu0 %417  ;;  %v421_v42 = vmul.f32 %v1738_v40, %v1734_v31 }
 0x3ac   : > { %1739 = vrcp.f32 %v418_v39 }
 0x3b2   : > { %v1740_v41 = vpop.eup %1739 }
 0x3b3   : > { %v422_v43 = vmul.f32 %v1740_v41, %v1736_v34 }
 0x3b5   : > { %v423_v44 = vpack.c.bf16 %v422_v43, %v421_v42 }
 0x3b7   : > { %1556 = vmatmul.msk.bf16.vlgmr.msra.gmra.mxu3 %vm399_vm13, %v423_v44 }
 0x3bb   : > { %v451_v45 = vpop.permute.xlu1 %450 }
 0x3be   : > { %v595_v46 = vpop.permute.xlu0 %594 }
 0x3bf   : > { %v600_v47 = vsel %vm376_vm10, %v595_v46, 0 }
 0x3c0   : > { %609 = vmatpush.bf16.xpose.msra.mxu3 %v600_v47 }
 0x3c3   : > { %v522_v48 = vpop.permute.xlu1 %521 }
 0x3c4   : > { %1559 = vmatmul.msk.bf16.vlgmr.msrb.gmra.mxu2 %vm376_vm10, %v522_v48 }
 0x3c6   : > { %v593_v49 = vpop.permute.xlu0 %592 }
 0x3c7   : > { %1557 = vmatmul.msk.bf16.vlgmr.msrb.gmra.mxu3 %vm376_vm10, %v451_v45 }
 0x3d7   : > { %1561 = vmatmul.msk.bf16.vlgmr.msra.gmra.mxu3 %vm376_vm10, %v593_v49 }
 0x43a   : > { %v1976_v50 = vpop.f32.mrf.mxu3 }
 0x442   : > { %v1978_v51 = vpop.f32.mrf.mxu3 }
 0x447   : > { %v540_v52 = vpop.f32.mrf.mxu2 }
 0x448   : > { %v545_v53 = vmul.f32 0.35355338, %v540_v52 }
 0x44a   : > { %v469_v54 = vpop.f32.mrf.mxu3  ;;  %v547_v55 = vsel %vm399_vm13, %v545_v53, -inf }
 0x44b   : > { %v474_v56 = vmul.f32 0.35355338, %v469_v54  ;;  %548 = vmax.xlane.f32.xlu2 %v547_v55 }
 0x44d   : > { %v476_v57 = vsel %vm399_vm13, %v474_v56, -inf }
 0x44e   : > { %477 = vmax.xlane.f32.xlu1 %v476_v57 }
 0x44f   : > { %v542_v58 = vpop.f32.mrf.mxu2 }
 0x450   : > { %v546_v59 = vmul.f32 0.35355338, %v542_v58 }
 0x452   : > { %v471_v60 = vpop.f32.mrf.mxu3  ;;  %v550_v62 = vsel %vm403_vm14, %v546_v59, -inf }
 0x453   : > { %v475_v61 = vmul.f32 0.35355338, %v471_v60 }
 0x455   : > { %v479_v63 = vsel %vm403_vm14, %v475_v61, -inf }
 0x456   : > { %551 = vmax.xlane.f32.xlu1 %v550_v62  ;;  %480 = vmax.xlane.f32.xlu0 %v479_v63 }
 0x45a   : > { %v611_v0 = vpop.f32.mrf.mxu3 }
 0x45b   : > { %v616_v1 = vmul.f32 0.35355338, %v611_v0 }
 0x45d   : > { %v618_v2 = vsel %vm399_vm13, %v616_v1, -inf }
 0x45e   : > { %619 = vmax.xlane.f32.xlu0 %v618_v2 }
 0x462   : > { %v613_v3 = vpop.f32.mrf.mxu3 }
 0x463   : > { %v617_v4 = vmul.f32 0.35355338, %v613_v3 }
 0x465   : > { %v621_v6 = vsel %vm403_vm14, %v617_v4, -inf }
 0x466   : > { %622 = vmax.xlane.f32.xlu2 %v621_v6 }
 0x47e   : > { %499 = vrot.lane.b32.xlu2 %v1940_v5, %s1835_s25 }
 0x486   : > { %698 = vrot.lane.b32.xlu2 %v1916_v26, %s1838_s28 }
 0x4be   : > { %v549_v7 = vpop.xlane.xlu2 %548 }
 0x4bf   : > { %v553_v9 = vsub.f32 %v545_v53, %v549_v7 }
 0x4c1   : > { %v555_v10 = vmul.f32 1.442695, %v553_v9  ;;  %v478_v13 = vpop.xlane.xlu1 %477 }
 0x4c2   : > { %v482_v14 = vsub.f32 %v474_v56, %v478_v13 }
 0x4c3   : > { %1741 = vpow2.f32 %v555_v10 }
 0x4c4   : > { %v484_v15 = vmul.f32 1.442695, %v482_v14 }
 0x4c6   : > { %1743 = vpow2.f32 %v484_v15 }
 0x4c9   : > { %v1988_v16 = vpop.eup %1741  ;;  %v552_v17 = vpop.xlane.xlu1 %551 }
 0x4ca   : > { %v481_v18 = vpop.xlane.xlu0 %480  ;;  %v554_v19 = vsub.f32 %v546_v59, %v552_v17  ;;  %v559_v20 = vsel %vm399_vm13, %v1988_v16, 0.0 }
 0x4cb   : > { %560 = vadd.xlane.f32.xlu1 %v559_v20  ;;  %v483_v23 = vsub.f32 %v475_v61, %v481_v18 }
 0x4cc   : > { %v557_v21 = vmul.f32 1.442695, %v554_v19  ;;  %v1744_v24 = vpop.eup %1743 }
 0x4cd   : > { %v486_v25 = vmul.f32 1.442695, %v483_v23  ;;  %v488_v30 = vsel %vm399_vm13, %v1744_v24, 0.0 }
 0x4ce   : > { %1745 = vpow2.f32 %v557_v21 }
 0x4cf   : > { %1747 = vpow2.f32 %v486_v25 }
 0x4d2   : > { %v620_v27 = vpop.xlane.xlu0 %619 }
 0x4d3   : > { %v624_v28 = vsub.f32 %v616_v1, %v620_v27  ;;  %489 = vadd.xlane.f32.xlu1 %v488_v30 }
 0x4d4   : > { %v1746_v31 = vpop.eup %1745 }
 0x4d5   : > { %v626_v32 = vmul.f32 1.442695, %v624_v28  ;;  %v562_v33 = vsel %vm403_vm14, %v1746_v31, 0.0  ;;  %v1748_v35 = vpop.eup %1747 }
 0x4d6   : > { %563 = vadd.xlane.f32.xlu0 %v562_v33  ;;  %v491_v39 = vsel %vm403_vm14, %v1748_v35, 0.0 }
 0x4d7   : > { %1749 = vpow2.f32 %v626_v32 }
 0x4d9   : > { %v623_v34 = vpop.xlane.xlu2 %622 }
 0x4da   : > { %v625_v36 = vsub.f32 %v617_v4, %v623_v34 }
 0x4dc   : > { %v628_v38 = vmul.f32 1.442695, %v625_v36 }
 0x4dd   : > { %v1750_v37 = vpop.eup %1749 }
 0x4de   : > { %v630_v40 = vsel %vm399_vm13, %v1750_v37, 0.0  ;;  %1751 = vpow2.f32 %v628_v38  ;;  %492 = vadd.xlane.f32.xlu0 %v491_v39 }
 0x4df   : > { %631 = vadd.xlane.f32.xlu1 %v630_v40 }
 0x4e1   : > { %v500_v41 = vpop.permute.xlu2 %499 }
 0x4e2   : > { %v505_v42 = vand.u32 %v500_v41, %v1950_v11 }
 0x4e4   : > { %v1752_v43 = vpop.eup %1751  ;;  %514 = vmatpush.bf16.msrb.mxu1 %v505_v42 }
 0x4e5   : > { %v633_v44 = vsel %vm403_vm14, %v1752_v43, 0.0 }
 0x4e6   : > { %634 = vadd.xlane.f32.xlu0 %v633_v44 }
 0x4e9   : > { %v699_v6 = vpop.permute.xlu2 %698 }
 0x4ea   : > { %711 = vmatpush.bf16.msra.mxu2 %v699_v6 }
 0x4f8   : > { %570 = vrot.lane.b32.xlu1 %v1940_v5, %s1836_s26 }
 0x4fa   : > { %641 = vrot.lane.b32.xlu0 %v1940_v5, %s1837_s27 }
 0x500   : > { %696 = vrot.lane.b32.xlu1 %v1923_v29, %s1838_s28 }
 0x53e   : > { %v561_v45 = vpop.xlane.xlu1 %560 }
 0x546   : > { %v490_v47 = vpop.xlane.xlu1 %489 }
 0x547   : > { %1753 = vrcp.f32 %v490_v47 }
 0x549   : > { %v564_v46 = vpop.xlane.xlu0 %563 }
 0x54d   : > { %v1754_v49 = vpop.eup %1753 }
 0x54e   : > { %v496_v53 = vmul.f32 %v1754_v49, %v1744_v24 }
 0x551   : > { %v493_v48 = vpop.xlane.xlu0 %492 }
 0x552   : > { %1755 = vrcp.f32 %v493_v48  ;;  %v632_v56 = vpop.xlane.xlu1 %631 }
 0x553   : > { %1757 = vrcp.f32 %v564_v46 }
 0x554   : > { %1759 = vrcp.f32 %v561_v45 }
 0x558   : > { %v1756_v52 = vpop.eup %1755 }
 0x559   : > { %v497_v54 = vmul.f32 %v1756_v52, %v1748_v35  ;;  %v635_v5 = vpop.xlane.xlu0 %634  ;;  %v1758_v57 = vpop.eup %1757 }
 0x55a   : > { %1761 = vrcp.f32 %v635_v5  ;;  %v1760_v58 = vpop.eup %1759  ;;  %v568_v60 = vmul.f32 %v1758_v57, %v1746_v31  ;;  %v1647_v57 = vld [vmem:[%s2267_s2 + $0x18] sm:$0xff] }
 0x55b   : > { %v498_v55 = vpack.c.bf16 %v497_v54, %v496_v53  ;;  %1763 = vrcp.f32 %v632_v56  ;;  %v567_v26 = vmul.f32 %v1760_v58, %v1988_v16  ;;  %v1646_v58 = vld [vmem:[%s2267_s2 + $0x10] sm:$0xff] }
 0x55d   : > { %1558 = vmatmul.msk.bf16.vlgmr.msrb.gmra.mxu1 %vm399_vm13, %v498_v55  ;;  %v569_v2 = vpack.c.bf16 %v568_v60, %v567_v26 }
 0x560   : > { %v1762_v59 = vpop.eup %1761 }
 0x561   : > { %v1764_v63 = vpop.eup %1763  ;;  %v639_v0 = vmul.f32 %v1762_v59, %v1752_v43 }
 0x562   : > { %v638_v3 = vmul.f32 %v1764_v63, %v1750_v37 }
 0x564   : > { %v640_v4 = vpack.c.bf16 %v639_v0, %v638_v3 }
 0x56a   : > { %v571_v61 = vpop.permute.xlu1 %570 }
 0x56b   : > { %v576_v62 = vand.u32 %v571_v61, %v1950_v11 }
 0x56c   : > { %v642_v29 = vpop.permute.xlu0 %641 }
 0x56d   : > { %585 = vmatpush.bf16.msrb.mxu0 %v576_v62  ;;  %v647_v1 = vand.u32 %v642_v29, %v1950_v11 }
 0x56f   : > { %656 = vmatpush.bf16.msra.mxu1 %v647_v1 }
 0x570   : > { %1560 = vmatmul.msk.bf16.vlgmr.msrb.gmra.mxu0 %vm399_vm13, %v569_v2 }
 0x571   : > { %801 = vmatpush.bf16.msra.mxu0 %v1647_v57 }
 0x572   : > { %1562 = vmatmul.msk.bf16.vlgmr.msra.gmra.mxu1 %vm399_vm13, %v640_v4  ;;  %v697_v19 = vpop.permute.xlu1 %696 }
 0x573   : > { %712 = vmatpush.bf16.msra.mxu2 %v697_v19 }
 0x575   : > { %802 = vmatpush.bf16.msra.mxu0 %v1646_v58 }
 0x5da   : > { %v516_v7 = vpop.f32.mrf.mxu1 }
 0x5e2   : > { %v518_v9 = vpop.f32.mrf.mxu1 }
 0x5e3   : > { %v1686_v10 = vpack.i.bf16 %v518_v9, %v516_v7 }
 0x5e5   : > { %1687 = vrot.lane.b32.xlu2 %v1686_v10, %s1839_s29 }
 0x5ed   : > { %v587_v13 = vpop.f32.mrf.mxu0 }
 0x5ef   : > { %v658_v14 = vpop.f32.mrf.mxu1 }
 0x5f5   : > { %v589_v15 = vpop.f32.mrf.mxu0 }
 0x5f6   : > { %v1681_v16 = vpack.i.bf16 %v589_v15, %v587_v13 }
 0x5f7   : > { %v660_v17 = vpop.f32.mrf.mxu1 }
 0x5f8   : > { %1682 = vrot.lane.b32.xlu0 %v1681_v16, %s1840_s30  ;;  %v1691_v18 = vpack.i.bf16 %v660_v17, %v658_v14  ;;  %v1715_v16 = vld [vmem:[%s2268_s3 + $0x4] ss:$0 sm:$0xff] }
 0x5fa   : > { %1692 = vrot.lane.b32.xlu2 %v1691_v18, %s1841_s5 }
 0x63f   : > { %v1688_v20 = vpop.permute.xlu2 %1687 }
 0x640   : > { %v1690_v21 = vunpack.i.h.bf16 %v1688_v20  ;;  %v1689_v23 = vunpack.i.l.bf16 %v1688_v20 }
 0x642   : > { %v688_v30 = vsel %vm376_vm10, %v1978_v51, %v1690_v21  ;;  %v687_v31 = vsel %vm376_vm10, %v1976_v50, %v1689_v23  ;;  %v1714_v51 = vld [vmem:[%s2268_s3 + $0x3] ss:$0 sm:$0xff] }
 0x654   : > { %v1693_v24 = vpop.permute.xlu2 %1692 }
 0x655   : > { %v1695_v32 = vunpack.i.h.bf16 %v1693_v24  ;;  %v1694_v33 = vunpack.i.l.bf16 %v1693_v24  ;;  %v1716_v24 = vld [vmem:[%s2268_s3 + $0x5] ss:$0 sm:$0xff] }
 0x66a   : > { %v1683_v25 = vpop.permute.xlu0 %1682 }
 0x66b   : > { %v1685_v27 = vunpack.i.h.bf16 %v1683_v25  ;;  %v1684_v28 = vunpack.i.l.bf16 %v1683_v25 }
 0x66d   : > { %v691_v34 = vsel %vm689_vm15, %v688_v30, %v1685_v27  ;;  %v690_v35 = vsel %vm689_vm15, %v687_v31, %v1684_v28  ;;  %v1649_v31 = vld [vmem:[%s2267_s2 + $0x28] sm:$0xff] }
 0x66e   : > { %v694_v36 = vsel %vm692_vm0, %v691_v34, %v1695_v32  ;;  %v693_v37 = vsel %vm692_vm0, %v690_v35, %v1694_v33  ;;  %846 = vmatpush.bf16.xpose.msrb.mxu3 %v1649_v31  ;;  %v1648_v32 = vld [vmem:[%s2267_s2 + $0x20] sm:$0xff] }
 0x66f   : > { %v695_v38 = vpack.c.bf16 %v694_v36, %v693_v37  ;;  %v1717_v33 = vld [vmem:[%s2268_s3 + $0x6] ss:$0 sm:$0xff] }
 0x671   : > { %1563 = vmatmul.msk.bf16.vlgmr.msra.gmra.mxu2 %vm278_vm1, %v695_v38 }
 0x676   : > { %847 = vmatpush.bf16.xpose.msrb.mxu3 %v1648_v32 }
 0x6f4   : > { %v714_v39 = vpop.f32.mrf.mxu2 }
 0x6f5   : > { %v719_v50 = vadd.f32 %v714_v39, %v1896_v8 }
 0x6f7   : > { %v2028_v40 = vadd.f32 %v1714_v51, %v719_v50 }
 0x6f9   : > { %v724_v41 = vsel %vm278_vm1, %v2028_v40, 0.0  ;;  %v732_v42 = vmul.f32 %v2028_v40, %v2028_v40 }
 0x6fa   : > { %725 = vadd.xlane.f32.xlu0 %v724_v41 }
 0x6fb   : > { %v734_v43 = vsel %vm278_vm1, %v732_v42, 0.0 }
 0x6fc   : > { %735 = vadd.xlane.f32.xlu1 %v734_v43  ;;  %v716_v44 = vpop.f32.mrf.mxu2 }
 0x6fd   : > { %v720_v45 = vadd.f32 %v716_v44, %v1903_v12 }
 0x6ff   : > { %v2036_v46 = vadd.f32 %v1714_v51, %v720_v45 }
 0x701   : > { %v727_v8 = vsel %vm282_vm2, %v2036_v46, 0.0  ;;  %v733_v47 = vmul.f32 %v2036_v46, %v2036_v46 }
 0x702   : > { %728 = vadd.xlane.f32.xlu2 %v727_v8 }
 0x703   : > { %v737_v48 = vsel %vm282_vm2, %v733_v47, 0.0 }
 0x70a   : > { %738 = vadd.xlane.f32.xlu2 %v737_v48 }
 0x76d   : > { %v726_v49 = vpop.xlane.xlu0 %725 }
 0x76e   : > { %v730_v52 = vmul.f32 %v726_v49, %v1910_v22 }
 0x76f   : > { %v736_v53 = vpop.xlane.xlu1 %735 }
 0x770   : > { %v742_v54 = vmul.f32 %v730_v52, %v730_v52  ;;  %v740_v55 = vmul.f32 %v736_v53, %v1910_v22  ;;  %v746_v14 = vsub.f32 %v2028_v40, %v730_v52 }
 0x772   : > { %v744_v12 = vsub.f32 %v740_v55, %v742_v54 }
 0x774   : > { %v748_v5 = vadd.f32 1e-06, %v744_v12 }
 0x775   : > { %v729_v56 = vpop.xlane.xlu2 %728 }
 0x776   : > { %1765 = vrsqrt.f32 %v748_v5  ;;  %v731_v59 = vmul.f32 %v729_v56, %v1910_v22  ;;  %vm756_vm4 = vweird.f32 %v748_v5  ;;  %v1718_v56 = vld [vmem:[%s2268_s3 + $0x7] ss:$0 sm:$0xff] }
 0x778   : > { %v743_v63 = vmul.f32 %v731_v59, %v731_v59  ;;  %v747_v19 = vsub.f32 %v2036_v46, %v731_v59 }
 0x77c   : > { %v1766_v60 = vpop.eup %1765 }
 0x77d   : > { %v751_v61 = vmul.f32 %v1766_v60, %v748_v5  ;;  %v739_v62 = vpop.xlane.xlu2 %738  ;;  %vm757_vm3 = vweird.f32 %v1766_v60 }
 0x77e   : > { %v741_v26 = vmul.f32 %v739_v62, %v1910_v22  ;;  %vm758_vm5 = vmor %vm756_vm4, %vm757_vm3 }
 0x77f   : > { %v752_v0 = vmul.f32 %v1766_v60, %v751_v61 }
 0x780   : > { %v745_v29 = vsub.f32 %v741_v26, %v743_v63 }
 0x781   : > { %v753_v2 = vmul.f32 0.5, %v752_v0 }
 0x782   : > { %v749_v1 = vadd.f32 1e-06, %v745_v29 }
 0x783   : > { %v754_v3 = vsub.f32 1.5, %v753_v2 }
 0x784   : > { %1767 = vrsqrt.f32 %v749_v1  ;;  %vm766_vm7 = vweird.f32 %v749_v1 }
 0x785   : > { %v755_v6 = vmul.f32 %v1766_v60, %v754_v3 }
 0x787   : > { %v759_v10 = vsel %vm758_vm5, %v1766_v60, %v755_v6 }
 0x788   : > { %v770_v17 = vmul.f32 %v759_v10, %v746_v14  ;;  %v2101_v10 = vld [vmem:[%s2267_s2 + $0x30] sm:$0xff] }
 0x78a   : > { %v1768_v4 = vpop.eup %1767  ;;  %v773_v21 = vmul.f32 %v1715_v16, %v770_v17 }
 0x78b   : > { %v761_v7 = vmul.f32 %v1768_v4, %v749_v1  ;;  %vm767_vm6 = vweird.f32 %v1768_v4 }
 0x78c   : > { %vm768_vm8 = vmor %vm766_vm7, %vm767_vm6  ;;  %v776_v27 = vadd.f32 %v1716_v24, %v773_v21  ;;  %vm1459_vm7 = vcmask 523264  }
 0x78d   : > { %v762_v9 = vmul.f32 %v1768_v4, %v761_v7 }
 0x78f   : > { %v763_v13 = vmul.f32 0.5, %v762_v9 }
 0x791   : > { %v764_v15 = vsub.f32 1.5, %v763_v13 }
 0x793   : > { %v765_v18 = vmul.f32 %v1768_v4, %v764_v15 }
 0x795   : > { %v769_v20 = vsel %vm768_vm8, %v1768_v4, %v765_v18  ;;  %vm1461_vm8 = vcmask 785408  }
 0x796   : > { %v771_v23 = vmul.f32 %v769_v20, %v747_v19 }
 0x798   : > { %v774_v25 = vmul.f32 %v1715_v16, %v771_v23 }
 0x79a   : > { %v777_v28 = vadd.f32 %v1716_v24, %v774_v25 }
 0x79c   : > { %v778_v30 = vpack.c.bf16 %v777_v28, %v776_v27 }
 0x79e   : > { %1572 = vmatmul.msk.bf16.vlgmr.msra.gmra.mxu0 %vm278_vm1, %v778_v30 }
 0x81b   : > { %v804_v34 = vpop.f32.mrf.mxu0 }
 0x81c   : > { %v805_v35 = vadd.f32 %v1717_v33, %v804_v34 }
 0x81e   : > { %v809_v36 = vmul.f32 %v805_v35, %v805_v35 }
 0x820   : > { %v811_v37 = vmul.f32 %v809_v36, %v805_v35 }
 0x822   : > { %v813_v38 = vmul.f32 0.044715, %v811_v37  ;;  %v1719_v37 = vld [vmem:[%s2268_s3 + $0x8] ss:$0 sm:$0xff] }
 0x823   : > { %v806_v51 = vpop.f32.mrf.mxu0 }
 0x824   : > { %v815_v39 = vadd.f32 %v813_v38, %v805_v35  ;;  %v807_v50 = vadd.f32 %v1717_v33, %v806_v51 }
 0x826   : > { %v817_v41 = vmul.f32 0.7978846, %v815_v39  ;;  %v810_v42 = vmul.f32 %v807_v50, %v807_v50 }
 0x828   : > { %v812_v43 = vmul.f32 %v810_v42, %v807_v50  ;;  %1769 = vtanh.f32 %v817_v41 }
 0x82a   : > { %v814_v44 = vmul.f32 0.044715, %v812_v43  ;;  %v1720_v43 = vld [vmem:[%s2268_s3 + $0x9] ss:$0 sm:$0xff] }
 0x82c   : > { %v816_v45 = vadd.f32 %v814_v44, %v807_v50 }
 0x82e   : > { %v818_v8 = vmul.f32 0.7978846, %v816_v45  ;;  %v1770_v47 = vpop.eup %1769 }
 0x82f   : > { %v821_v48 = vadd.f32 1.0, %v1770_v47 }
 0x830   : > { %1771 = vtanh.f32 %v818_v8 }
 0x831   : > { %v823_v52 = vmul.f32 0.5, %v821_v48 }
 0x833   : > { %v825_v55 = vmul.f32 %v823_v52, %v805_v35 }
 0x836   : > { %v1772_v49 = vpop.eup %1771 }
 0x837   : > { %v822_v53 = vadd.f32 1.0, %v1772_v49  ;;  %v1721_v49 = vld [vmem:[%s2268_s3 + $0xa] ss:$0 sm:$0xff] }
 0x839   : > { %v824_v54 = vmul.f32 0.5, %v822_v53 }
 0x83b   : > { %v826_v12 = vmul.f32 %v824_v54, %v807_v50 }
 0x83d   : > { %v827_v5 = vpack.c.bf16 %v826_v12, %v825_v55 }
 0x83f   : > { %848 = vmatmul.bf16.vlgmr.msrb.gmra.mxu3 %v827_v5 }
 0x8c2   : > { %v849_v57 = vpop.f32.mrf.mxu3 }
 0x8c3   : > { %v854_v58 = vadd.f32 %v849_v57, %v2028_v40 }
 0x8c5   : > { %v2075_v59 = vadd.f32 %v1718_v56, %v854_v58 }
 0x8c7   : > { %v881_v60 = vsel %vm278_vm1, %v2075_v59, 0.0  ;;  %v889_v61 = vmul.f32 %v2075_v59, %v2075_v59 }
 0x8c8   : > { %882 = vadd.xlane.f32.xlu0 %v881_v60 }
 0x8c9   : > { %v891_v62 = vsel %vm278_vm1, %v889_v61, 0.0 }
 0x8ca   : > { %892 = vadd.xlane.f32.xlu2 %v891_v62  ;;  %v851_v63 = vpop.f32.mrf.mxu3 }
 0x8cb   : > { %v855_v26 = vadd.f32 %v851_v63, %v2036_v46  ;;  %v2095_v46 = vld [vmem:[%s2267_s2 + $0x38] sm:$0xff] }
 0x8cc   : > { %958 = vmatpush.bf16.msrb.mxu1 %v2095_v46 }
 0x8cd   : > { %v2083_v0 = vadd.f32 %v1718_v56, %v855_v26 }
 0x8cf   : > { %v884_v40 = vsel %vm282_vm2, %v2083_v0, 0.0  ;;  %v890_v29 = vmul.f32 %v2083_v0, %v2083_v0 }
 0x8d0   : > { %885 = vadd.xlane.f32.xlu1 %v884_v40  ;;  %959 = vmatpush.bf16.msrb.mxu1 %v2101_v10 }
 0x8d1   : > { %v894_v1 = vsel %vm282_vm2, %v890_v29, 0.0 }
 0x8d2   : > { %895 = vadd.xlane.f32.xlu0 %v894_v1 }
 0x93b   : > { %v883_v2 = vpop.xlane.xlu0 %882 }
 0x93c   : > { %v887_v3 = vmul.f32 %v883_v2, %v1910_v22 }
 0x93d   : > { %v893_v4 = vpop.xlane.xlu2 %892 }
 0x93e   : > { %v899_v6 = vmul.f32 %v887_v3, %v887_v3  ;;  %v897_v7 = vmul.f32 %v893_v4, %v1910_v22  ;;  %v903_v35 = vsub.f32 %v2075_v59, %v887_v3 }
 0x940   : > { %v901_v9 = vsub.f32 %v897_v7, %v899_v6 }
 0x942   : > { %v905_v13 = vadd.f32 1e-06, %v901_v9 }
 0x943   : > { %v886_v14 = vpop.xlane.xlu1 %885 }
 0x944   : > { %1773 = vrsqrt.f32 %v905_v13  ;;  %v888_v15 = vmul.f32 %v886_v14, %v1910_v22  ;;  %vm913_vm12 = vweird.f32 %v905_v13 }
 0x945   : > { %v896_v16 = vpop.xlane.xlu0 %895 }
 0x946   : > { %v900_v17 = vmul.f32 %v888_v15, %v888_v15  ;;  %v898_v18 = vmul.f32 %v896_v16, %v1910_v22  ;;  %v904_v39 = vsub.f32 %v2083_v0, %v888_v15 }
 0x948   : > { %v902_v19 = vsub.f32 %v898_v18, %v900_v17 }
 0x94a   : > { %v1774_v20 = vpop.eup %1773  ;;  %v906_v21 = vadd.f32 1e-06, %v902_v19 }
 0x94b   : > { %v908_v23 = vmul.f32 %v1774_v20, %v905_v13  ;;  %vm914_vm9 = vweird.f32 %v1774_v20 }
 0x94c   : > { %1775 = vrsqrt.f32 %v906_v21  ;;  %vm915_vm3 = vmor %vm913_vm12, %vm914_vm9  ;;  %vm923_vm5 = vweird.f32 %v906_v21 }
 0x94d   : > { %v909_v24 = vmul.f32 %v1774_v20, %v908_v23 }
 0x94f   : > { %v910_v25 = vmul.f32 0.5, %v909_v24 }
 0x951   : > { %v911_v27 = vsub.f32 1.5, %v910_v25 }
 0x952   : > { %v1776_v28 = vpop.eup %1775 }
 0x953   : > { %v912_v30 = vmul.f32 %v1774_v20, %v911_v27  ;;  %v918_v31 = vmul.f32 %v1776_v28, %v906_v21  ;;  %vm924_vm4 = vweird.f32 %v1776_v28 }
 0x954   : > { %vm925_vm6 = vmor %vm923_vm5, %vm924_vm4 }
 0x955   : > { %v919_v32 = vmul.f32 %v1776_v28, %v918_v31  ;;  %v916_v33 = vsel %vm915_vm3, %v1774_v20, %v912_v30 }
 0x956   : > { %v927_v38 = vmul.f32 %v916_v33, %v903_v35 }
 0x957   : > { %v920_v34 = vmul.f32 0.5, %v919_v32 }
 0x958   : > { %v930_v41 = vmul.f32 %v1719_v37, %v927_v38 }
 0x959   : > { %v921_v36 = vsub.f32 1.5, %v920_v34 }
 0x95a   : > { %v933_v45 = vadd.f32 %v1720_v43, %v930_v41 }
 0x95b   : > { %v922_v51 = vmul.f32 %v1776_v28, %v921_v36 }
 0x95d   : > { %v926_v50 = vsel %vm925_vm6, %v1776_v28, %v922_v51 }
 0x95e   : > { %v928_v42 = vmul.f32 %v926_v50, %v904_v39 }
 0x960   : > { %v931_v44 = vmul.f32 %v1719_v37, %v928_v42 }
 0x962   : > { %v934_v8 = vadd.f32 %v1720_v43, %v931_v44 }
 0x964   : > { %v935_v47 = vpack.c.bf16 %v934_v8, %v933_v45 }
 0x966   : > { %1609 = vmatmul.msk.bf16.vlgmr.msrb.gmra.mxu1 %vm278_vm1, %v935_v47 }
 0x9e3   : > { %v961_v48 = vpop.f32.mrf.mxu1 }
 0x9e4   : > { %v962_v53 = vadd.f32 %v1721_v49, %v961_v48 }
 0x9eb   : > { %v963_v52 = vpop.f32.mrf.mxu1 }
 0x9ec   : > { %v964_v54 = vadd.f32 %v1721_v49, %v963_v52 }
 0x9ee   : > { %v2118_v55 = vpack.c.bf16 %v964_v54, %v962_v53 }
 0x9f0   : > { %1037 = vrot.lane.b32.xlu0 %v2118_v55, %s1831_s21  ;;  %1039 = vrot.lane.b32.xlu2 %v2118_v55, %s1830_s20 }
 0x9f1   : > { %968 = vrot.lane.b32.xlu1 %v2118_v55, %s1827_s18 }
 0x9f8   : > { %1181 = vrot.lane.b32.xlu0 %v2118_v55, %s1832_s22  ;;  %1108 = vrot.lane.b32.xlu2 %v2118_v55, %s1833_s23 }
 0x9f9   : > { %1110 = vrot.lane.b32.xlu1 %v2118_v55, %s1829_s19 }
 0xa01   : > { %1179 = vrot.lane.b32.xlu1 %v2118_v55, %s1834_s24 }
 0xa4a   : > { %v1040_v12 = vpop.permute.xlu2 %1039 }
 0xa4b   : > { %v1045_v5 = vsel %vm376_vm10, %v1040_v12, 0 }
 0xa4c   : > { %1054 = vmatpush.bf16.xpose.msra.mxu3 %v1045_v5 }
 0xa52   : > { %v1109_v40 = vpop.permute.xlu2 %1108 }
 0xa62   : > { %v1038_v56 = vpop.permute.xlu0 %1037 }
 0xa63   : > { %v969_v57 = vpop.permute.xlu1 %968  ;;  %1612 = vmatmul.msk.bf16.vlgmr.msra.gmra.mxu3 %vm376_vm10, %v1038_v56 }
 0xa64   : > { %v974_v58 = vsel %vm376_vm10, %v969_v57, 0 }
 0xa65   : > { %983 = vmatpush.bf16.xpose.msrb.mxu2 %v974_v58 }
 0xa6a   : > { %v1182_v60 = vpop.permute.xlu0 %1181 }
 0xa6b   : > { %v1187_v61 = vsel %vm376_vm10, %v1182_v60, 0  ;;  %v1111_v62 = vpop.permute.xlu1 %1110 }
 0xa6c   : > { %v1116_v63 = vsel %vm376_vm10, %v1111_v62, 0  ;;  %1610 = vmatmul.msk.bf16.vlgmr.msrb.gmra.mxu2 %vm376_vm10, %v2118_v55  ;;  %1196 = vmatpush.bf16.xpose.msrb.mxu3 %v1187_v61 }
 0xa6d   : > { %1125 = vmatpush.bf16.xpose.msra.mxu2 %v1116_v63 }
 0xa73   : > { %v1180_v26 = vpop.permute.xlu1 %1179 }
 0xa74   : > { %1616 = vmatmul.msk.bf16.vlgmr.msrb.gmra.mxu3 %vm376_vm10, %v1180_v26 }
 0xa7c   : > { %1614 = vmatmul.msk.bf16.vlgmr.msra.gmra.mxu2 %vm376_vm10, %v1109_v40 }
 0xae6   : > { %v1056_v29 = vpop.f32.mrf.mxu3 }
 0xae7   : > { %v1061_v1 = vmul.f32 0.35355338, %v1056_v29 }
 0xae9   : > { %v1063_v2 = vsel %vm399_vm13, %v1061_v1, -inf }
 0xaea   : > { %1064 = vmax.xlane.f32.xlu1 %v1063_v2 }
 0xaee   : > { %v1058_v4 = vpop.f32.mrf.mxu3 }
 0xaef   : > { %v985_v3 = vpop.f32.mrf.mxu2  ;;  %v1062_v9 = vmul.f32 0.35355338, %v1058_v4 }
 0xaf0   : > { %v990_v6 = vmul.f32 0.35355338, %v985_v3 }
 0xaf1   : > { %v1066_v16 = vsel %vm403_vm14, %v1062_v9, -inf }
 0xaf2   : > { %v992_v7 = vsel %vm399_vm13, %v990_v6, -inf }
 0xaf3   : > { %993 = vmax.xlane.f32.xlu0 %v992_v7 }
 0xaf7   : > { %v987_v13 = vpop.f32.mrf.mxu2  ;;  %v1198_v15 = vpop.f32.mrf.mxu3 }
 0xaf8   : > { %v991_v14 = vmul.f32 0.35355338, %v987_v13  ;;  %v2147_v18 = vmul.f32 0.35355338, %v1198_v15 }
 0xafa   : > { %v995_v17 = vsel %vm403_vm14, %v991_v14, -inf  ;;  %v1205_v23 = vsel %vm399_vm13, %v2147_v18, -inf }
 0xafb   : > { %1067 = vmax.xlane.f32.xlu0 %v1066_v16  ;;  %996 = vmax.xlane.f32.xlu2 %v995_v17 }
 0xaff   : > { %v1127_v19 = vpop.f32.mrf.mxu2  ;;  %v1200_v24 = vpop.f32.mrf.mxu3 }
 0xb00   : > { %v1132_v20 = vmul.f32 0.35355338, %v1127_v19  ;;  %v1204_v25 = vmul.f32 0.35355338, %v1200_v24 }
 0xb02   : > { %v1134_v21 = vsel %vm399_vm13, %v1132_v20, -inf  ;;  %v1208_v31 = vsel %vm403_vm14, %v1204_v25, -inf }
 0xb03   : > { %1135 = vmax.xlane.f32.xlu2 %v1134_v21  ;;  %1206 = vmax.xlane.f32.xlu0 %v1205_v23 }
 0xb07   : > { %v1129_v27 = vpop.f32.mrf.mxu2 }
 0xb08   : > { %v1133_v28 = vmul.f32 0.35355338, %v1129_v27 }
 0xb0a   : > { %v1137_v30 = vsel %vm403_vm14, %v1133_v28, -inf }
 0xb0b   : > { %1138 = vmax.xlane.f32.xlu1 %v1137_v30  ;;  %1209 = vmax.xlane.f32.xlu2 %v1208_v31 }
 0xb5d   : > { %v1065_v32 = vpop.xlane.xlu1 %1064 }
 0xb5e   : > { %v1069_v33 = vsub.f32 %v1061_v1, %v1065_v32 }
 0xb60   : > { %v1071_v34 = vmul.f32 1.442695, %v1069_v33 }
 0xb62   : > { %1777 = vpow2.f32 %v1071_v34 }
 0xb66   : > { %v994_v35 = vpop.xlane.xlu0 %993 }
 0xb67   : > { %v998_v36 = vsub.f32 %v990_v6, %v994_v35 }
 0xb68   : > { %v2154_v37 = vpop.eup %1777 }
 0xb69   : > { %v1000_v38 = vmul.f32 1.442695, %v998_v36  ;;  %v1075_v51 = vsel %vm399_vm13, %v2154_v37, 0.0 }
 0xb6a   : > { %1076 = vadd.xlane.f32.xlu2 %v1075_v51 }
 0xb6b   : > { %1779 = vpow2.f32 %v1000_v38 }
 0xb6e   : > { %v1068_v39 = vpop.xlane.xlu0 %1067  ;;  %v997_v50 = vpop.xlane.xlu2 %996 }
 0xb6f   : > { %v1070_v41 = vsub.f32 %v1062_v9, %v1068_v39  ;;  %v999_v42 = vsub.f32 %v991_v14, %v997_v50 }
 0xb71   : > { %v2158_v43 = vpop.eup %1779  ;;  %v1073_v44 = vmul.f32 1.442695, %v1070_v41  ;;  %v1002_v45 = vmul.f32 1.442695, %v999_v42 }
 0xb72   : > { %v1004_v8 = vsel %vm399_vm13, %v2158_v43, 0.0 }
 0xb73   : > { %1781 = vpow2.f32 %v1073_v44  ;;  %1005 = vadd.xlane.f32.xlu1 %v1004_v8 }
 0xb74   : > { %1783 = vpow2.f32 %v1002_v45 }
 0xb76   : > { %v1136_v47 = vpop.xlane.xlu2 %1135  ;;  %v1207_v2 = vpop.xlane.xlu0 %1206 }
 0xb77   : > { %v1140_v48 = vsub.f32 %v1132_v20, %v1136_v47  ;;  %v1211_v3 = vsub.f32 %v2147_v18, %v1207_v2 }
 0xb79   : > { %v1782_v49 = vpop.eup %1781  ;;  %v1142_v52 = vmul.f32 1.442695, %v1140_v48  ;;  %v1213_v4 = vmul.f32 1.442695, %v1211_v3 }
 0xb7a   : > { %v1784_v53 = vpop.eup %1783  ;;  %v1078_v54 = vsel %vm403_vm14, %v1782_v49, 0.0 }
 0xb7b   : > { %1785 = vpow2.f32 %v1142_v52  ;;  %1079 = vadd.xlane.f32.xlu1 %v1078_v54  ;;  %v1007_v12 = vsel %vm403_vm14, %v1784_v53, 0.0 }
 0xb7c   : > { %1008 = vadd.xlane.f32.xlu0 %v1007_v12 }
 0xb7e   : > { %v1139_v5 = vpop.xlane.xlu1 %1138  ;;  %v1210_v56 = vpop.xlane.xlu2 %1209 }
 0xb7f   : > { %v1141_v57 = vsub.f32 %v1133_v28, %v1139_v5  ;;  %v1212_v61 = vsub.f32 %v1204_v25, %v1210_v56 }
 0xb81   : > { %v1786_v58 = vpop.eup %1785  ;;  %v1144_v60 = vmul.f32 1.442695, %v1141_v57  ;;  %v1215_v63 = vmul.f32 1.442695, %v1212_v61 }
 0xb82   : > { %v1146_v62 = vsel %vm399_vm13, %v1786_v58, 0.0  ;;  %1086 = vrot.lane.b32.xlu2 %v2118_v55, %s1835_s25 }
 0xb83   : > { %1147 = vadd.xlane.f32.xlu1 %v1146_v62  ;;  %1787 = vpow2.f32 %v1144_v60 }
 0xb84   : > { %1789 = vpow2.f32 %v1215_v63 }
 0xb85   : > { %1791 = vpow2.f32 %v1213_v4 }
 0xb89   : > { %v1788_v26 = vpop.eup %1787 }
 0xb8a   : > { %1157 = vrot.lane.b32.xlu2 %v2118_v55, %s1836_s26  ;;  %v1149_v40 = vsel %vm403_vm14, %v1788_v26, 0.0  ;;  %v1790_v29 = vpop.eup %1789 }
 0xb8b   : > { %1150 = vadd.xlane.f32.xlu1 %v1149_v40  ;;  %v1220_v1 = vsel %vm403_vm14, %v1790_v29, 0.0  ;;  %v1792_v6 = vpop.eup %1791 }
 0xb8c   : > { %v1217_v7 = vsel %vm399_vm13, %v1792_v6, 0.0 }
 0xb90   : > { %1015 = vrot.lane.b32.xlu0 %v2118_v55, %s1826_s17 }
 0xb92   : > { %1283 = vrot.lane.b32.xlu2 %v2095_v46, %s1838_s28 }
 0xb93   : > { %1221 = vadd.xlane.f32.xlu1 %v1220_v1 }
 0xbac   : > { %1228 = vrot.lane.b32.xlu1 %v2118_v55, %s1837_s27 }
 0xbba   : > { %1218 = vadd.xlane.f32.xlu0 %v1217_v7 }
 0xbdd   : > { %v1077_v9 = vpop.xlane.xlu2 %1076 }
 0xbde   : > { %1793 = vrcp.f32 %v1077_v9 }
 0xbe4   : > { %v1794_v16 = vpop.eup %1793 }
 0xbe5   : > { %v1087_v13 = vpop.permute.xlu2 %1086  ;;  %v1083_v18 = vmul.f32 %v1794_v16, %v2154_v37 }
 0xbe6   : > { %v1092_v14 = vand.u32 %v1087_v13, %v1950_v11  ;;  %v1006_v46 = vpop.xlane.xlu1 %1005 }
 0xbe8   : > { %1101 = vmatpush.bf16.msra.mxu1 %v1092_v14 }
 0xbed   : > { %v1158_v25 = vpop.permute.xlu2 %1157 }
 0xbee   : > { %v1080_v15 = vpop.xlane.xlu1 %1079  ;;  %v1163_v32 = vand.u32 %v1158_v25, %v1950_v11 }
 0xbef   : > { %1795 = vrcp.f32 %v1080_v15  ;;  %v1009_v19 = vpop.xlane.xlu0 %1008  ;;  %v1722_v15 = vld [vmem:[%s2268_s3 + $0xb] ss:$0 sm:$0xff] }
 0xbf0   : > { %1797 = vrcp.f32 %v1009_v19 }
 0xbf1   : > { %1799 = vrcp.f32 %v1006_v46 }
 0xbf5   : > { %v1796_v17 = vpop.eup %1795  ;;  %v1284_v56 = vpop.permute.xlu2 %1283 }
 0xbf6   : > { %v1084_v55 = vmul.f32 %v1796_v17, %v1782_v49  ;;  %v1148_v21 = vpop.xlane.xlu1 %1147  ;;  %v1798_v23 = vpop.eup %1797  ;;  %1296 = vmatpush.bf16.msrb.mxu2 %v1284_v56 }
 0xbf7   : > { %v1800_v24 = vpop.eup %1799  ;;  %v1013_v27 = vmul.f32 %v1798_v23, %v1784_v53 }
 0xbf8   : > { %v1085_v20 = vpack.c.bf16 %v1084_v55, %v1083_v18  ;;  %v1012_v31 = vmul.f32 %v1800_v24, %v2158_v43 }
 0xbfa   : > { %1613 = vmatmul.msk.bf16.vlgmr.msra.gmra.mxu1 %vm399_vm13, %v1085_v20  ;;  %v1014_v33 = vpack.c.bf16 %v1013_v27, %v1012_v31 }
 0xbfe   : > { %v1151_v34 = vpop.xlane.xlu1 %1150 }
 0xbff   : > { %1801 = vrcp.f32 %v1151_v34 }
 0xc00   : > { %1803 = vrcp.f32 %v1148_v21 }
 0xc02   : > { %v1016_v28 = vpop.permute.xlu0 %1015 }
 0xc03   : > { %v1021_v30 = vand.u32 %v1016_v28, %v1950_v11 }
 0xc05   : > { %1030 = vmatpush.bf16.msrb.mxu0 %v1021_v30  ;;  %v1802_v35 = vpop.eup %1801 }
 0xc06   : > { %v1804_v36 = vpop.eup %1803  ;;  %v1155_v37 = vmul.f32 %v1802_v35, %v1788_v26  ;;  %v1222_v39 = vpop.xlane.xlu1 %1221  ;;  %v1652_v35 = vld [vmem:[%s2267_s2 + $0x40] sm:$0xff] }
 0xc07   : > { %v1154_v38 = vmul.f32 %v1804_v36, %v1786_v58  ;;  %1805 = vrcp.f32 %v1222_v39 }
 0xc08   : > { %1611 = vmatmul.msk.bf16.vlgmr.msrb.gmra.mxu0 %vm399_vm13, %v1014_v33 }
 0xc09   : > { %1172 = vmatpush.bf16.msra.mxu0 %v1163_v32  ;;  %v1156_v51 = vpack.c.bf16 %v1155_v37, %v1154_v38 }
 0xc0d   : > { %v1806_v43 = vpop.eup %1805 }
 0xc0e   : > { %v1226_v45 = vmul.f32 %v1806_v43, %v1790_v29 }
 0xc18   : > { %1615 = vmatmul.msk.bf16.vlgmr.msra.gmra.mxu0 %vm399_vm13, %v1156_v51 }
 0xc1e   : > { %v1229_v50 = vpop.permute.xlu1 %1228 }
 0xc1f   : > { %v1234_v41 = vand.u32 %v1229_v50, %v1950_v11 }
 0xc21   : > { %1243 = vmatpush.bf16.msrb.mxu1 %v1234_v41 }
 0xc2d   : > { %v1219_v42 = vpop.xlane.xlu0 %1218 }
 0xc2e   : > { %1807 = vrcp.f32 %v1219_v42 }
 0xc34   : > { %v1808_v44 = vpop.eup %1807 }
 0xc35   : > { %v1225_v8 = vmul.f32 %v1808_v44, %v1792_v6 }
 0xc37   : > { %v1227_v47 = vpack.c.bf16 %v1226_v45, %v1225_v8 }
 0xc39   : > { %1617 = vmatmul.msk.bf16.vlgmr.msrb.gmra.mxu1 %vm399_vm13, %v1227_v47 }
 0xc77   : > { %v1103_v48 = vpop.f32.mrf.mxu1 }
 0xc7f   : > { %v1105_v49 = vpop.f32.mrf.mxu1 }
 0xc80   : > { %v1696_v52 = vpack.i.bf16 %v1105_v49, %v1103_v48 }
 0xc82   : > { %1697 = vrot.lane.b32.xlu2 %v1696_v52, %s1839_s29 }
 0xc85   : > { %v1032_v53 = vpop.f32.mrf.mxu0 }
 0xc8d   : > { %v1034_v54 = vpop.f32.mrf.mxu0 }
 0xc95   : > { %v1174_v12 = vpop.f32.mrf.mxu0 }
 0xc9d   : > { %v1176_v11 = vpop.f32.mrf.mxu0 }
 0xc9e   : > { %v1701_v5 = vpack.i.bf16 %v1176_v11, %v1174_v12 }
 0xca0   : > { %1702 = vrot.lane.b32.xlu2 %v1701_v5, %s1840_s30  ;;  %v1723_v5 = vld [vmem:[%s2268_s3 + $0xc] ss:$0 sm:$0xff] }
 0xca8   : > { %1281 = vrot.lane.b32.xlu2 %v2101_v10, %s1838_s28 }
 0xcb6   : > { %v1245_v57 = vpop.f32.mrf.mxu1 }
 0xcbe   : > { %v1247_v58 = vpop.f32.mrf.mxu1 }
 0xcbf   : > { %v1706_v60 = vpack.i.bf16 %v1247_v58, %v1245_v57 }
 0xcc1   : > { %1707 = vrot.lane.b32.xlu1 %v1706_v60, %s1841_s5 }
 0xcdc   : > { %v1698_v61 = vpop.permute.xlu2 %1697 }
 0xcdd   : > { %v1700_v26 = vunpack.i.h.bf16 %v1698_v61  ;;  %v1699_v40 = vunpack.i.l.bf16 %v1698_v61 }
 0xcdf   : > { %v1275_v3 = vsel %vm376_vm10, %v1034_v54, %v1700_v26  ;;  %v1274_v4 = vsel %vm376_vm10, %v1032_v53, %v1699_v40 }
 0xcfa   : > { %v1703_v62 = vpop.permute.xlu2 %1702 }
 0xcfb   : > { %v1705_v29 = vunpack.i.h.bf16 %v1703_v62  ;;  %v1704_v1 = vunpack.i.l.bf16 %v1703_v62 }
 0xcfd   : > { %v1277_v7 = vsel %vm689_vm15, %v1275_v3, %v1705_v29  ;;  %v1276_v9 = vsel %vm689_vm15, %v1274_v4, %v1704_v1  ;;  %v1654_v3 = vld [vmem:[%s2267_s2 + $0x50] sm:$0xff]  ;;  %v1725_v4 = vld [vmem:[%s2268_s3 + $0xe] ss:$0 sm:$0xff] }
 0xd02   : > { %v1282_v63 = vpop.permute.xlu2 %1281 }
 0xd03   : > { %1297 = vmatpush.bf16.msrb.mxu2 %v1282_v63  ;;  %v1724_v63 = vld [vmem:[%s2268_s3 + $0xd] ss:$0 sm:$0xff] }
 0xd33   : > { %v1708_v2 = vpop.permute.xlu1 %1707 }
 0xd34   : > { %v1710_v6 = vunpack.i.h.bf16 %v1708_v2  ;;  %v1709_v10 = vunpack.i.l.bf16 %v1708_v2  ;;  %v1655_v2 = vld [vmem:[%s2267_s2 + $0x58] sm:$0xff] }
 0xd35   : > { %1431 = vmatpush.bf16.xpose.msra.mxu3 %v1655_v2 }
 0xd36   : > { %v1279_v13 = vsel %vm692_vm0, %v1277_v7, %v1710_v6  ;;  %v1278_v14 = vsel %vm692_vm0, %v1276_v9, %v1709_v10 }
 0xd37   : > { %v1280_v46 = vpack.c.bf16 %v1279_v13, %v1278_v14 }
 0xd39   : > { %1618 = vmatmul.msk.bf16.vlgmr.msrb.gmra.mxu2 %vm278_vm1, %v1280_v46 }
 0xd3d   : > { %1432 = vmatpush.bf16.xpose.msra.mxu3 %v1654_v3 }
 0xdbc   : > { %v1299_v16 = vpop.f32.mrf.mxu2 }
 0xdbd   : > { %v1304_v17 = vadd.f32 %v1299_v16, %v2075_v59 }
 0xdbf   : > { %v2205_v18 = vadd.f32 %v1722_v15, %v1304_v17 }
 0xdc1   : > { %v1309_v19 = vsel %vm278_vm1, %v2205_v18, 0.0  ;;  %v1317_v55 = vmul.f32 %v2205_v18, %v2205_v18 }
 0xdc2   : > { %1310 = vadd.xlane.f32.xlu0 %v1309_v19 }
 0xdc3   : > { %v1319_v20 = vsel %vm278_vm1, %v1317_v55, 0.0 }
 0xdc4   : > { %1320 = vadd.xlane.f32.xlu2 %v1319_v20  ;;  %v1301_v21 = vpop.f32.mrf.mxu2 }
 0xdc5   : > { %v1305_v23 = vadd.f32 %v1301_v21, %v2083_v0  ;;  %v1653_v0 = vld [vmem:[%s2267_s2 + $0x48] sm:$0xff] }
 0xdc6   : > { %1386 = vmatpush.bf16.msrb.mxu0 %v1653_v0 }
 0xdc7   : > { %v2213_v24 = vadd.f32 %v1722_v15, %v1305_v23 }
 0xdc9   : > { %v1312_v59 = vsel %vm282_vm2, %v2213_v24, 0.0  ;;  %v1318_v25 = vmul.f32 %v2213_v24, %v2213_v24 }
 0xdca   : > { %1313 = vadd.xlane.f32.xlu1 %v1312_v59  ;;  %1387 = vmatpush.bf16.msrb.mxu0 %v1652_v35 }
 0xdcb   : > { %v1322_v27 = vsel %vm282_vm2, %v1318_v25, 0.0 }
 0xdcc   : > { %1323 = vadd.xlane.f32.xlu0 %v1322_v27 }
 0xe35   : > { %v1311_v28 = vpop.xlane.xlu0 %1310 }
 0xe36   : > { %v1315_v30 = vmul.f32 %v1311_v28, %v1910_v22 }
 0xe37   : > { %v1321_v31 = vpop.xlane.xlu2 %1320 }
 0xe38   : > { %v1327_v32 = vmul.f32 %v1315_v30, %v1315_v30  ;;  %v1325_v33 = vmul.f32 %v1321_v31, %v1910_v22  ;;  %v1331_v11 = vsub.f32 %v2205_v18, %v1315_v30 }
 0xe3a   : > { %v1329_v34 = vsub.f32 %v1325_v33, %v1327_v32  ;;  %v1726_v33 = vld [vmem:[%s2268_s3 + $0xf] ss:$0 sm:$0xff] }
 0xe3c   : > { %v1333_v36 = vadd.f32 1e-06, %v1329_v34 }
 0xe3d   : > { %v1314_v37 = vpop.xlane.xlu1 %1313 }
 0xe3e   : > { %1809 = vrsqrt.f32 %v1333_v36  ;;  %v1316_v38 = vmul.f32 %v1314_v37, %v1910_v22  ;;  %vm1341_vm10 = vweird.f32 %v1333_v36 }
 0xe3f   : > { %v1324_v51 = vpop.xlane.xlu0 %1323 }
 0xe40   : > { %v1328_v39 = vmul.f32 %v1316_v38, %v1316_v38  ;;  %v1326_v50 = vmul.f32 %v1324_v51, %v1910_v22  ;;  %v1332_v58 = vsub.f32 %v2213_v24, %v1316_v38 }
 0xe42   : > { %v1330_v41 = vsub.f32 %v1326_v50, %v1328_v39 }
 0xe44   : > { %v1810_v42 = vpop.eup %1809  ;;  %v1334_v43 = vadd.f32 1e-06, %v1330_v41 }
 0xe45   : > { %v1336_v44 = vmul.f32 %v1810_v42, %v1333_v36  ;;  %vm1342_vm2 = vweird.f32 %v1810_v42 }
 0xe46   : > { %1811 = vrsqrt.f32 %v1334_v43  ;;  %vm1343_vm13 = vmor %vm1341_vm10, %vm1342_vm2  ;;  %vm1351_vm15 = vweird.f32 %v1334_v43 }
 0xe47   : > { %v1337_v45 = vmul.f32 %v1810_v42, %v1336_v44 }
 0xe49   : > { %v1338_v8 = vmul.f32 0.5, %v1337_v45 }
 0xe4b   : > { %v1339_v47 = vsub.f32 1.5, %v1338_v8 }
 0xe4c   : > { %v1812_v48 = vpop.eup %1811 }
 0xe4d   : > { %v1340_v49 = vmul.f32 %v1810_v42, %v1339_v47  ;;  %v1346_v52 = vmul.f32 %v1812_v48, %v1334_v43  ;;  %vm1352_vm14 = vweird.f32 %v1812_v48 }
 0xe4e   : > { %vm1353_vm0 = vmor %vm1351_vm15, %vm1352_vm14 }
 0xe4f   : > { %v1347_v53 = vmul.f32 %v1812_v48, %v1346_v52  ;;  %v1344_v54 = vsel %vm1343_vm13, %v1810_v42, %v1340_v49 }
 0xe50   : > { %v1355_v56 = vmul.f32 %v1344_v54, %v1331_v11 }
 0xe51   : > { %v1348_v12 = vmul.f32 0.5, %v1347_v53 }
 0xe52   : > { %v1358_v61 = vmul.f32 %v1723_v5, %v1355_v56 }
 0xe53   : > { %v1349_v22 = vsub.f32 1.5, %v1348_v12 }
 0xe54   : > { %v1361_v40 = vadd.f32 %v1724_v63, %v1358_v61 }
 0xe55   : > { %v1350_v57 = vmul.f32 %v1812_v48, %v1349_v22 }
 0xe57   : > { %v1354_v60 = vsel %vm1353_vm0, %v1812_v48, %v1350_v57 }
 0xe58   : > { %v1356_v62 = vmul.f32 %v1354_v60, %v1332_v58 }
 0xe5a   : > { %v1359_v26 = vmul.f32 %v1723_v5, %v1356_v62 }
 0xe5c   : > { %v1362_v29 = vadd.f32 %v1724_v63, %v1359_v26 }
 0xe5e   : > { %v1363_v1 = vpack.c.bf16 %v1362_v29, %v1361_v40 }
 0xe60   : > { %1627 = vmatmul.msk.bf16.vlgmr.msrb.gmra.mxu0 %vm278_vm1, %v1363_v1 }
 0xedd   : > { %v1389_v6 = vpop.f32.mrf.mxu0 }
 0xede   : > { %v1390_v10 = vadd.f32 %v1725_v4, %v1389_v6 }
 0xee0   : > { %v1394_v7 = vmul.f32 %v1390_v10, %v1390_v10 }
 0xee2   : > { %v1396_v9 = vmul.f32 %v1394_v7, %v1390_v10 }
 0xee4   : > { %v1398_v13 = vmul.f32 0.044715, %v1396_v9 }
 0xee5   : > { %v1391_v14 = vpop.f32.mrf.mxu0 }
 0xee6   : > { %v1400_v46 = vadd.f32 %v1398_v13, %v1390_v10  ;;  %v1392_v15 = vadd.f32 %v1725_v4, %v1391_v14 }
 0xee8   : > { %v1402_v16 = vmul.f32 0.7978846, %v1400_v46  ;;  %v1395_v17 = vmul.f32 %v1392_v15, %v1392_v15 }
 0xeea   : > { %v1397_v19 = vmul.f32 %v1395_v17, %v1392_v15  ;;  %1813 = vtanh.f32 %v1402_v16 }
 0xeec   : > { %v1399_v55 = vmul.f32 0.044715, %v1397_v19 }
 0xeee   : > { %v1401_v20 = vadd.f32 %v1399_v55, %v1392_v15 }
 0xef0   : > { %v1403_v21 = vmul.f32 0.7978846, %v1401_v20  ;;  %v1814_v23 = vpop.eup %1813 }
 0xef1   : > { %v1406_v59 = vadd.f32 1.0, %v1814_v23 }
 0xef2   : > { %1815 = vtanh.f32 %v1403_v21 }
 0xef3   : > { %v1408_v27 = vmul.f32 0.5, %v1406_v59 }
 0xef5   : > { %v1410_v31 = vmul.f32 %v1408_v27, %v1390_v10 }
 0xef8   : > { %v1816_v25 = vpop.eup %1815 }
 0xef9   : > { %v1407_v28 = vadd.f32 1.0, %v1816_v25 }
 0xefb   : > { %v1409_v30 = vmul.f32 0.5, %v1407_v28 }
 0xefd   : > { %v1411_v0 = vmul.f32 %v1409_v30, %v1392_v15 }
 0xeff   : > { %v1412_v32 = vpack.c.bf16 %v1411_v0, %v1410_v31 }
 0xf01   : > { %1433 = vmatmul.bf16.vlgmr.msra.gmra.mxu3 %v1412_v32 }
 0xf84   : > { %v1434_v34 = vpop.f32.mrf.mxu3 }
 0xf85   : > { %v1439_v35 = vadd.f32 %v1434_v34, %v2205_v18 }
 0xf87   : > { %v1442_v36 = vadd.f32 %v1726_v33, %v1439_v35 }
 0xf89   : > { %v1446_v37 = vrot.slane %v1442_v36, 4 }
 0xf8b   : > { %1447 = vrot.lane.b32.xlu0 %v1446_v37, %s1838_s28 }
 0xf8c   : > { %v1436_v38 = vpop.f32.mrf.mxu3 }
 0xf8d   : > { %v1440_v51 = vadd.f32 %v1436_v38, %v2213_v24 }
 0xf8f   : > { %v1443_v39 = vadd.f32 %v1726_v33, %v1440_v51 }
 0xf91   : > { %v1444_v50 = vsel %vm429_vm11, %v1443_v39, 0.0 }
 0xf92   : > { %v1454_v41 = vrot.slane %v1444_v50, 4 }
 0xf93   : > { %1451 = vrot.lane.b32.xlu0 %v1444_v50, %s1826_s17 }
 0xf9b   : > { %1455 = vrot.lane.b32.xlu0 %v1454_v41, %s1827_s18 }
 0xffd   : > { %v1448_v42 = vpop.permute.xlu0 %1447 }
 0xffe   : > { %v1458_v18 = vsel %vm278_vm1, %v1442_v36, %v1448_v42 }
0x1005   : > { %v1452_v43 = vpop.permute.xlu0 %1451 }
0x1006   : > { %v1460_v24 = vsel %vm1459_vm7, %v1458_v18, %v1452_v43 }
0x100d   : > { %v1456_v44 = vpop.permute.xlu0 %1455 }
0x100e   : > { %v1462_v45 = vsel %vm1461_vm8, %v1460_v24, %v1456_v44 }
0x100f   : > { %1463 = vst [vmem:[%s195_s6] sm:$0xf] %v1462_v45 }
0x1010 PF: > { %s14_s15 = sadd.s32 1, %s1823_s15  }
0x1011   : > { %p11_p4 = scmp.ge.s32.totalorder %s14_s15, 4  }
0x1013   :  { %13 = sbr.rel (!%p11_p4) target bundleno = 1 (0x1), region = 68 }

</bundles_post_ra>
